<compile_context>
chip_gen: v7x
topology: tpu7x:2x2x1
jax: 0.10.0
libtpu: 0.0.40
codegen_flags: <defaults>
</compile_context>

<pallas_src>
import functools

import jax
import jax.numpy as jnp
from jax import lax
from jax.experimental import pallas as pl
from jax.experimental.pallas import tpu as pltpu

BN_EPS = 1e-5


def _round_up(x, m):
    return (x + m - 1) // m * m


# ------------------------------ Pallas kernel --------------------------------

def _bottleneck_kernel(x_ref, w1_ref, w2_ref, w3_ref, w4_ref, w5_ref, o_ref,
                       ext_ref, *, H, W, WP):
    """Fused Bottleneck forward for one batch element.

    x_ref  : (1, S, CP) bf16   zero-padded NHWC image, rows*cols flattened
             (S = (H+2)*WP; 1 zero row top/bottom, 1 zero col left, >=1 zero col right)
    wN_ref : BN-folded, channel-padded bf16 weights (VMEM resident, constant index maps)
    o_ref  : (1, H*WP, CP) bf16 output slab (image rows only, pad columns still present)
    ext_ref: (S, CP) f32 scratch: fused activation + pre-zeroed 1-row apron for conv4
             (replaces the old jnp.concatenate copies)
    """
    S2 = H * WP                 # flat rows of the image region (padded rows [1, H+1))
    S = (H + 2) * WP            # flat rows of the whole padded slab
    CP = x_ref.shape[-1]

    x = x_ref[0]                # (S, CP) bf16

    def conv3x3(a_f32, w_ref):
        # 3x3 SAME conv on the flat (rows*WP, C) slab.  The three dw-shifted slabs are
        # built once with pltpu.roll (XLU) and downcast to bf16 once each; every tap
        # slice then starts at a multiple of WP (sublane-aligned).  Roll wraparound only
        # injects rows that are already zero (pad corners / aprons), so it never touches
        # image-column outputs.
        s = a_f32.shape[0]
        taps = (pltpu.roll(a_f32, shift=1, axis=0).astype(jnp.bfloat16),      # A[r-1]
                a_f32.astype(jnp.bfloat16),                                   # A[r]
                pltpu.roll(a_f32, shift=s - 1, axis=0).astype(jnp.bfloat16))  # A[r+1]
        acc = jnp.zeros((S2, w_ref.shape[2]), jnp.float32)
        for kh in range(3):
            base = kh * WP      # multiple of WP -> aligned
            for kw in range(3):
                acc = acc + jnp.dot(taps[kw][base:base + S2, :], w_ref[kh * 3 + kw],
                                    preferred_element_type=jnp.float32)
        return acc

    # conv1 (1x1) + bn1 + relu over the whole padded slab; pad pixels stay exactly 0,
    # which is what conv2's SAME padding requires.
    out1 = jnp.maximum(jnp.dot(x, w1_ref[...], preferred_element_type=jnp.float32), 0.0)

    # conv2 (3x3) + bn2 + relu on the H image rows.
    out2 = jnp.maximum(conv3x3(out1, w2_ref), 0.0).astype(jnp.bfloat16)

    # conv3 (1x1) + bn3, DAF fuse (+identity), relu.  Zero the left/right pad columns so
    # conv4 sees exact SAME-padding zeros around the image; the top/bottom zero rows come
    # from the pre-zeroed apron in ext_ref.
    fused = jnp.dot(out2, w3_ref[...], preferred_element_type=jnp.float32)
    fused = jnp.maximum(fused + x[WP:WP + S2, :].astype(jnp.float32), 0.0)
    col = lax.broadcasted_iota(jnp.int32, (S2, 1), 0) % WP
    fused = jnp.where((col >= 1) & (col <= W), fused, 0.0)

    # Stage the fused activation into the persistent scratch with static slices.
    ext_ref[0:WP, :] = jnp.zeros((WP, CP), jnp.float32)
    ext_ref[WP + S2:S, :] = jnp.zeros((WP, CP), jnp.float32)
    ext_ref[WP:WP + S2, :] = fused

    # conv4 (3x3) + bn4 + relu and conv5 (1x1) + bn5 + relu on the image rows.
    out4 = jnp.maximum(conv3x3(ext_ref[...], w4_ref), 0.0).astype(jnp.bfloat16)
    out5 = jnp.maximum(jnp.dot(out4, w5_ref[...], preferred_element_type=jnp.float32), 0.0)

    o_ref[...] = out5.astype(o_ref.dtype).reshape(1, S2, CP)


# ------------------------------ wrapper ---------------------------------------

def _pack_w(w_hwio, cin_p, cout_p):
    """HWIO -> (KH*KW, cin_p, cout_p) bf16, zero-padded channels; squeeze 1x1."""
    kh, kw, cin, cout = w_hwio.shape
    w = jnp.pad(w_hwio.astype(jnp.bfloat16),
                ((0, 0), (0, 0), (0, cin_p - cin), (0, cout_p - cout)))
    w = w.reshape(kh * kw, cin_p, cout_p)
    return w[0] if kh * kw == 1 else w


@jax.jit
def bottleneck_forward(x_nchw, weights):
    w1, w2, w3, w4, w5 = (weights[k] for k in ("w1", "w2", "w3", "w4", "w5"))
    B, C, H, W = x_nchw.shape
    width = w1.shape[-1]
    cexp = w3.shape[-1]
    assert w5.shape[-1] == C
    assert cexp == C, "DAF fuse requires planes * expansion == inplanes"

    CP = _round_up(C, 128)          # inplanes == planes*expansion channels, padded
    WIDTH_P = _round_up(width, 128)
    WP = _round_up(W + 2, 16)       # 1 pad col left + W + >=1 pad col right, 16-aligned
    assert WP >= W + 2, "need a zero column on BOTH sides of every image row"
    S = (H + 2) * WP
    S2 = H * WP

    # NCHW -> NHWC, zero-pad (1 row top/bottom, 1 col left, WP-W-1 cols right, channels
    # to CP), cast bf16, flatten rows*cols so one image is one contiguous pipelined block.
    x = jnp.transpose(x_nchw, (0, 2, 3, 1)).astype(jnp.bfloat16)
    x = jnp.pad(x, ((0, 0), (1, 1), (1, WP - W - 1), (0, CP - C)))
    x_flat = x.reshape(B, S, CP)

    w1p = _pack_w(w1, CP, WIDTH_P)
    w2p = _pack_w(w2, WIDTH_P, WIDTH_P)
    w3p = _pack_w(w3, WIDTH_P, CP)
    w4p = _pack_w(w4, CP, WIDTH_P)
    w5p = _pack_w(w5, WIDTH_P, CP)

    kernel = functools.partial(_bottleneck_kernel, H=H, W=W, WP=WP)

    out = pl.pallas_call(
        kernel,
        out_shape=jax.ShapeDtypeStruct((B, S2, CP), jnp.bfloat16),
        grid=(B,),
        in_specs=[
            pl.BlockSpec((1, S, CP), lambda b: (b, 0, 0)),             # x (auto-pipelined)
            pl.BlockSpec((CP, WIDTH_P), lambda b: (0, 0)),             # w1 (VMEM resident)
            pl.BlockSpec((9, WIDTH_P, WIDTH_P), lambda b: (0, 0, 0)),  # w2
            pl.BlockSpec((WIDTH_P, CP), lambda b: (0, 0)),             # w3
            pl.BlockSpec((9, CP, WIDTH_P), lambda b: (0, 0, 0)),       # w4
            pl.BlockSpec((WIDTH_P, CP), lambda b: (0, 0)),             # w5
        ],
        out_specs=pl.BlockSpec((1, S2, CP), lambda b: (b, 0, 0)),
        scratch_shapes=[pltpu.VMEM((S, CP), jnp.float32)],             # fused + zero apron
        compiler_params=pltpu.CompilerParams(
            dimension_semantics=("parallel",),     # one image per TC on v7x megacore
            vmem_limit_bytes=32 * 1024 * 1024,
        ),
    )(x_flat, w1p, w2p, w3p, w4p, w5p)

    # Compact bf16 epilogue: drop pad columns / padded channels, NHWC -> NCHW.
    out = out.reshape(B, H, WP, CP)[:, :, 1:1 + W, :C]
    return jnp.transpose(out, (0, 3, 1, 2)).astype(jnp.float32)


# ------------------------------ params + reference ----------------------------

def make_params(key, inplanes, planes, base_width=64, groups=1):
    """kaiming_normal(fan_out, relu) conv weights (HWIO) with eval-mode BN folded in,
    quantized to bf16 (the exact values both the kernel and the reference use)."""
    width = int(planes * (base_width / 64.0)) * groups
    cexp = planes * 16

    def kaiming(k, kh, kw, cin, cout):
        fan_out = cout * kh * kw
        std = (2.0 / fan_out) ** 0.5
        return std * jax.random.normal(k, (kh, kw, cin, cout), jnp.float32)

    ks = jax.random.split(key, 5)
    raw = {
        "w1": kaiming(ks[0], 1, 1, inplanes, width),
        "w2": kaiming(ks[1], 3, 3, width, width),
        "w3": kaiming(ks[2], 1, 1, width, cexp),
        "w4": kaiming(ks[3], 3, 3, cexp, width),
        "w5": kaiming(ks[4], 1, 1, width, inplanes),
    }
    # Eval-mode BN with gamma=1, beta=0, running_mean=0, running_var=1:
    #   y = x / sqrt(1 + eps); the shift is exactly 0, so folding the scale is exact.
    bn_scale = 1.0 / (1.0 + BN_EPS) ** 0.5
    folded = {k: (w * bn_scale).astype(jnp.bfloat16) for k, w in raw.items()}
    return folded, width, cexp


def bottleneck_reference(x_nchw, weights):
    """Pure-JAX (f32 lax.conv) reference using the same BN-folded bf16 weights."""
    dn = ("NHWC", "HWIO", "NHWC")

    def conv(x, w, pad):
        return lax.conv_general_dilated(x, w.astype(jnp.float32), (1, 1), pad,
                                        dimension_numbers=dn)

    x = jnp.transpose(x_nchw, (0, 2, 3, 1))
    out = jax.nn.relu(conv(x, weights["w1"], "VALID"))
    out = jax.nn.relu(conv(out, weights["w2"], "SAME"))
    out = jax.nn.relu(conv(out, weights["w3"], "VALID") + x)      # DAF fuse + relu
    out = jax.nn.relu(conv(out, weights["w4"], "SAME"))
    out = jax.nn.relu(conv(out, weights["w5"], "VALID"))
    return jnp.transpose(out, (0, 3, 1, 2))


# --------------------------------- main ----------------------------------------

if __name__ == "__main__":
    # Bottleneck(inplanes=64, planes=4, fuse_type='DAF'): width=4, planes*expansion=64.
    B, inplanes, H, W = 2, 64, 8, 8
    planes = 4

    key = jax.random.PRNGKey(0)
    kx, kw = jax.random.split(key)
    x = jax.random.normal(kx, (B, inplanes, H, W), jnp.float32)
    weights, width, cexp = make_params(kw, inplanes, planes)

    out = jax.block_until_ready(bottleneck_forward(x, weights))

    x_q = x.astype(jnp.bfloat16).astype(jnp.float32)   # same quantized input the kernel sees
    ref = jax.block_until_ready(bottleneck_reference(x_q, weights))

    max_err = float(jnp.max(jnp.abs(out - ref)))
    ref_scale = float(jnp.max(jnp.abs(ref)))
    if not max_err <= 5e-2 * max(ref_scale, 1.0):      # bf16 compute vs f32 reference
        raise AssertionError(
            f"Pallas output mismatch vs reference: max_err={max_err}, ref_scale={ref_scale}")
    print("KERNEL_OK")
</pallas_src>

<mosaic_0001>
module attributes {stable_mosaic.version = 11 : i64} {
  func.func @_bottleneck_kernel(%arg0: i32, %arg1: memref<1x160x128xbf16, #tpu.memory_space<vmem>>, %arg2: memref<128x128xbf16, #tpu.memory_space<vmem>>, %arg3: memref<9x128x128xbf16, #tpu.memory_space<vmem>>, %arg4: memref<128x128xbf16, #tpu.memory_space<vmem>>, %arg5: memref<9x128x128xbf16, #tpu.memory_space<vmem>>, %arg6: memref<128x128xbf16, #tpu.memory_space<vmem>>, %arg7: memref<1x128x128xbf16, #tpu.memory_space<vmem>>, %arg8: memref<160x128xf32, #tpu.memory_space<vmem>>) attributes {dimension_semantics = [#tpu.dimension_semantics<parallel>], iteration_bounds = array<i64: 2>, scalar_prefetch = 0 : i64, scratch_operands = 1 : i64, tpu.core_type = #tpu.core_type<tc>, window_params = [{transform_indices = @transform_0, window_bounds = array<i64: 1, 160, 128>}, {pipeline_mode = #tpu.pipeline_mode<synchronous>, transform_indices = @transform_1, window_bounds = array<i64: 128, 128>}, {pipeline_mode = #tpu.pipeline_mode<synchronous>, transform_indices = @transform_2, window_bounds = array<i64: 9, 128, 128>}, {pipeline_mode = #tpu.pipeline_mode<synchronous>, transform_indices = @transform_3, window_bounds = array<i64: 128, 128>}, {pipeline_mode = #tpu.pipeline_mode<synchronous>, transform_indices = @transform_4, window_bounds = array<i64: 9, 128, 128>}, {pipeline_mode = #tpu.pipeline_mode<synchronous>, transform_indices = @transform_5, window_bounds = array<i64: 128, 128>}, {transform_indices = @transform_6, window_bounds = array<i64: 1, 128, 128>}]} {
    %c0 = arith.constant 0 : index
    %c0_0 = arith.constant 0 : index
    %c0_1 = arith.constant 0 : index
    %0 = vector.load %arg1[%c0, %c0_0, %c0_1] : memref<1x160x128xbf16, #tpu.memory_space<vmem>>, vector<1x160x128xbf16>
    %1 = vector.shape_cast %0 : vector<1x160x128xbf16> to vector<160x128xbf16>
    %c0_2 = arith.constant 0 : index
    %c0_3 = arith.constant 0 : index
    %2 = vector.load %arg2[%c0_2, %c0_3] : memref<128x128xbf16, #tpu.memory_space<vmem>>, vector<128x128xbf16>
    %cst = arith.constant dense<0.000000e+00> : vector<160x128xf32>
    %3 = tpu.matmul %1, %2, %cst {dimension_numbers = #tpu.dot_dimension_numbers<[1], [0], [0], [1], [0, 0, 1, 1], [], []>} : vector<160x128xbf16>, vector<128x128xbf16>, vector<160x128xf32> -> vector<160x128xf32>
    %cst_4 = arith.constant 0.000000e+00 : f32
    %4 = vector.broadcast %cst_4 : f32 to vector<160x128xf32>
    %5 = arith.maximumf %3, %4 : vector<160x128xf32>
    %c1_i32 = arith.constant 1 : i32
    %6 = tpu.dynamic_rotate %5 by %c1_i32 dim 0 : vector<160x128xf32>, i32 -> vector<160x128xf32>
    %7 = arith.truncf %6 : vector<160x128xf32> to vector<160x128xbf16>
    %8 = arith.truncf %5 : vector<160x128xf32> to vector<160x128xbf16>
    %c159_i32 = arith.constant 159 : i32
    %9 = tpu.dynamic_rotate %5 by %c159_i32 dim 0 : vector<160x128xf32>, i32 -> vector<160x128xf32>
    %10 = arith.truncf %9 : vector<160x128xf32> to vector<160x128xbf16>
    %cst_5 = arith.constant 0.000000e+00 : f32
    %11 = vector.broadcast %cst_5 : f32 to vector<128x128xf32>
    %12 = vector.extract_strided_slice %7 {offsets = [0, 0], sizes = [128, 128], strides = [1, 1]} : vector<160x128xbf16> to vector<128x128xbf16>
    %c0_6 = arith.constant 0 : index
    %c0_7 = arith.constant 0 : index
    %c0_8 = arith.constant 0 : index
    %13 = vector.load %arg3[%c0_6, %c0_7, %c0_8] : memref<9x128x128xbf16, #tpu.memory_space<vmem>>, vector<1x128x128xbf16>
    %14 = vector.shape_cast %13 : vector<1x128x128xbf16> to vector<128x128xbf16>
    %cst_9 = arith.constant dense<0.000000e+00> : vector<128x128xf32>
    %15 = tpu.matmul %12, %14, %cst_9 {dimension_numbers = #tpu.dot_dimension_numbers<[1], [0], [0], [1], [0, 0, 1, 1], [], []>} : vector<128x128xbf16>, vector<128x128xbf16>, vector<128x128xf32> -> vector<128x128xf32>
    %16 = arith.addf %11, %15 : vector<128x128xf32>
    %17 = vector.extract_strided_slice %8 {offsets = [0, 0], sizes = [128, 128], strides = [1, 1]} : vector<160x128xbf16> to vector<128x128xbf16>
    %c1 = arith.constant 1 : index
    %c0_10 = arith.constant 0 : index
    %c0_11 = arith.constant 0 : index
    %18 = vector.load %arg3[%c1, %c0_10, %c0_11] : memref<9x128x128xbf16, #tpu.memory_space<vmem>>, vector<1x128x128xbf16>
    %19 = vector.shape_cast %18 : vector<1x128x128xbf16> to vector<128x128xbf16>
    %cst_12 = arith.constant dense<0.000000e+00> : vector<128x128xf32>
    %20 = tpu.matmul %17, %19, %cst_12 {dimension_numbers = #tpu.dot_dimension_numbers<[1], [0], [0], [1], [0, 0, 1, 1], [], []>} : vector<128x128xbf16>, vector<128x128xbf16>, vector<128x128xf32> -> vector<128x128xf32>
    %21 = arith.addf %16, %20 : vector<128x128xf32>
    %22 = vector.extract_strided_slice %10 {offsets = [0, 0], sizes = [128, 128], strides = [1, 1]} : vector<160x128xbf16> to vector<128x128xbf16>
    %c2 = arith.constant 2 : index
    %c0_13 = arith.constant 0 : index
    %c0_14 = arith.constant 0 : index
    %23 = vector.load %arg3[%c2, %c0_13, %c0_14] : memref<9x128x128xbf16, #tpu.memory_space<vmem>>, vector<1x128x128xbf16>
    %24 = vector.shape_cast %23 : vector<1x128x128xbf16> to vector<128x128xbf16>
    %cst_15 = arith.constant dense<0.000000e+00> : vector<128x128xf32>
    %25 = tpu.matmul %22, %24, %cst_15 {dimension_numbers = #tpu.dot_dimension_numbers<[1], [0], [0], [1], [0, 0, 1, 1], [], []>} : vector<128x128xbf16>, vector<128x128xbf16>, vector<128x128xf32> -> vector<128x128xf32>
    %26 = arith.addf %21, %25 : vector<128x128xf32>
    %27 = vector.extract_strided_slice %7 {offsets = [16, 0], sizes = [128, 128], strides = [1, 1]} : vector<160x128xbf16> to vector<128x128xbf16>
    %c3 = arith.constant 3 : index
    %c0_16 = arith.constant 0 : index
    %c0_17 = arith.constant 0 : index
    %28 = vector.load %arg3[%c3, %c0_16, %c0_17] : memref<9x128x128xbf16, #tpu.memory_space<vmem>>, vector<1x128x128xbf16>
    %29 = vector.shape_cast %28 : vector<1x128x128xbf16> to vector<128x128xbf16>
    %cst_18 = arith.constant dense<0.000000e+00> : vector<128x128xf32>
    %30 = tpu.matmul %27, %29, %cst_18 {dimension_numbers = #tpu.dot_dimension_numbers<[1], [0], [0], [1], [0, 0, 1, 1], [], []>} : vector<128x128xbf16>, vector<128x128xbf16>, vector<128x128xf32> -> vector<128x128xf32>
    %31 = arith.addf %26, %30 : vector<128x128xf32>
    %32 = vector.extract_strided_slice %8 {offsets = [16, 0], sizes = [128, 128], strides = [1, 1]} : vector<160x128xbf16> to vector<128x128xbf16>
    %c4 = arith.constant 4 : index
    %c0_19 = arith.constant 0 : index
    %c0_20 = arith.constant 0 : index
    %33 = vector.load %arg3[%c4, %c0_19, %c0_20] : memref<9x128x128xbf16, #tpu.memory_space<vmem>>, vector<1x128x128xbf16>
    %34 = vector.shape_cast %33 : vector<1x128x128xbf16> to vector<128x128xbf16>
    %cst_21 = arith.constant dense<0.000000e+00> : vector<128x128xf32>
    %35 = tpu.matmul %32, %34, %cst_21 {dimension_numbers = #tpu.dot_dimension_numbers<[1], [0], [0], [1], [0, 0, 1, 1], [], []>} : vector<128x128xbf16>, vector<128x128xbf16>, vector<128x128xf32> -> vector<128x128xf32>
    %36 = arith.addf %31, %35 : vector<128x128xf32>
    %37 = vector.extract_strided_slice %10 {offsets = [16, 0], sizes = [128, 128], strides = [1, 1]} : vector<160x128xbf16> to vector<128x128xbf16>
    %c5 = arith.constant 5 : index
    %c0_22 = arith.constant 0 : index
    %c0_23 = arith.constant 0 : index
    %38 = vector.load %arg3[%c5, %c0_22, %c0_23] : memref<9x128x128xbf16, #tpu.memory_space<vmem>>, vector<1x128x128xbf16>
    %39 = vector.shape_cast %38 : vector<1x128x128xbf16> to vector<128x128xbf16>
    %cst_24 = arith.constant dense<0.000000e+00> : vector<128x128xf32>
    %40 = tpu.matmul %37, %39, %cst_24 {dimension_numbers = #tpu.dot_dimension_numbers<[1], [0], [0], [1], [0, 0, 1, 1], [], []>} : vector<128x128xbf16>, vector<128x128xbf16>, vector<128x128xf32> -> vector<128x128xf32>
    %41 = arith.addf %36, %40 : vector<128x128xf32>
    %42 = vector.extract_strided_slice %7 {offsets = [32, 0], sizes = [128, 128], strides = [1, 1]} : vector<160x128xbf16> to vector<128x128xbf16>
    %c6 = arith.constant 6 : index
    %c0_25 = arith.constant 0 : index
    %c0_26 = arith.constant 0 : index
    %43 = vector.load %arg3[%c6, %c0_25, %c0_26] : memref<9x128x128xbf16, #tpu.memory_space<vmem>>, vector<1x128x128xbf16>
    %44 = vector.shape_cast %43 : vector<1x128x128xbf16> to vector<128x128xbf16>
    %cst_27 = arith.constant dense<0.000000e+00> : vector<128x128xf32>
    %45 = tpu.matmul %42, %44, %cst_27 {dimension_numbers = #tpu.dot_dimension_numbers<[1], [0], [0], [1], [0, 0, 1, 1], [], []>} : vector<128x128xbf16>, vector<128x128xbf16>, vector<128x128xf32> -> vector<128x128xf32>
    %46 = arith.addf %41, %45 : vector<128x128xf32>
    %47 = vector.extract_strided_slice %8 {offsets = [32, 0], sizes = [128, 128], strides = [1, 1]} : vector<160x128xbf16> to vector<128x128xbf16>
    %c7 = arith.constant 7 : index
    %c0_28 = arith.constant 0 : index
    %c0_29 = arith.constant 0 : index
    %48 = vector.load %arg3[%c7, %c0_28, %c0_29] : memref<9x128x128xbf16, #tpu.memory_space<vmem>>, vector<1x128x128xbf16>
    %49 = vector.shape_cast %48 : vector<1x128x128xbf16> to vector<128x128xbf16>
    %cst_30 = arith.constant dense<0.000000e+00> : vector<128x128xf32>
    %50 = tpu.matmul %47, %49, %cst_30 {dimension_numbers = #tpu.dot_dimension_numbers<[1], [0], [0], [1], [0, 0, 1, 1], [], []>} : vector<128x128xbf16>, vector<128x128xbf16>, vector<128x128xf32> -> vector<128x128xf32>
    %51 = arith.addf %46, %50 : vector<128x128xf32>
    %52 = vector.extract_strided_slice %10 {offsets = [32, 0], sizes = [128, 128], strides = [1, 1]} : vector<160x128xbf16> to vector<128x128xbf16>
    %c8 = arith.constant 8 : index
    %c0_31 = arith.constant 0 : index
    %c0_32 = arith.constant 0 : index
    %53 = vector.load %arg3[%c8, %c0_31, %c0_32] : memref<9x128x128xbf16, #tpu.memory_space<vmem>>, vector<1x128x128xbf16>
    %54 = vector.shape_cast %53 : vector<1x128x128xbf16> to vector<128x128xbf16>
    %cst_33 = arith.constant dense<0.000000e+00> : vector<128x128xf32>
    %55 = tpu.matmul %52, %54, %cst_33 {dimension_numbers = #tpu.dot_dimension_numbers<[1], [0], [0], [1], [0, 0, 1, 1], [], []>} : vector<128x128xbf16>, vector<128x128xbf16>, vector<128x128xf32> -> vector<128x128xf32>
    %56 = arith.addf %51, %55 : vector<128x128xf32>
    %cst_34 = arith.constant 0.000000e+00 : f32
    %57 = vector.broadcast %cst_34 : f32 to vector<128x128xf32>
    %58 = arith.maximumf %56, %57 : vector<128x128xf32>
    %59 = arith.truncf %58 : vector<128x128xf32> to vector<128x128xbf16>
    %c0_35 = arith.constant 0 : index
    %c0_36 = arith.constant 0 : index
    %60 = vector.load %arg4[%c0_35, %c0_36] : memref<128x128xbf16, #tpu.memory_space<vmem>>, vector<128x128xbf16>
    %cst_37 = arith.constant dense<0.000000e+00> : vector<128x128xf32>
    %61 = tpu.matmul %59, %60, %cst_37 {dimension_numbers = #tpu.dot_dimension_numbers<[1], [0], [0], [1], [0, 0, 1, 1], [], []>} : vector<128x128xbf16>, vector<128x128xbf16>, vector<128x128xf32> -> vector<128x128xf32>
    %62 = vector.extract_strided_slice %1 {offsets = [16, 0], sizes = [128, 128], strides = [1, 1]} : vector<160x128xbf16> to vector<128x128xbf16>
    %63 = arith.extf %62 : vector<128x128xbf16> to vector<128x128xf32>
    %64 = arith.addf %61, %63 : vector<128x128xf32>
    %cst_38 = arith.constant 0.000000e+00 : f32
    %65 = vector.broadcast %cst_38 : f32 to vector<128x128xf32>
    %66 = arith.maximumf %64, %65 : vector<128x128xf32>
    %67 = tpu.iota {dimensions = array<i32: 0>} : vector<128x1xi32>
    %c16_i32 = arith.constant 16 : i32
    %c0_i32 = arith.constant 0 : i32
    %68 = arith.cmpi eq, %c16_i32, %c0_i32 : i32
    %c1_i32_39 = arith.constant 1 : i32
    %69 = arith.select %68, %c1_i32_39, %c16_i32 : i32
    %70 = vector.broadcast %69 : i32 to vector<128x1xi32>
    %71 = arith.remsi %67, %70 : vector<128x1xi32>
    %c0_i32_40 = arith.constant 0 : i32
    %72 = vector.broadcast %c0_i32_40 : i32 to vector<128x1xi32>
    %73 = arith.cmpi ne, %71, %72 : vector<128x1xi32>
    %c0_i32_41 = arith.constant 0 : i32
    %74 = vector.broadcast %c0_i32_41 : i32 to vector<128x1xi32>
    %75 = arith.cmpi slt, %71, %74 : vector<128x1xi32>
    %c0_i32_42 = arith.constant 0 : i32
    %76 = arith.cmpi slt, %69, %c0_i32_42 : i32
    %77 = vector.broadcast %76 : i1 to vector<128x1xi1>
    %78 = vector.broadcast %77 : vector<128x1xi1> to vector<128x1xi1>
    %79 = arith.xori %75, %78 : vector<128x1xi1>
    %80 = arith.andi %79, %73 : vector<128x1xi1>
    %81 = vector.broadcast %69 : i32 to vector<128x1xi32>
    %82 = arith.addi %71, %81 : vector<128x1xi32>
    %83 = arith.select %80, %82, %71 : vector<128x1xi1>, vector<128x1xi32>
    %c1_i32_43 = arith.constant 1 : i32
    %84 = vector.broadcast %c1_i32_43 : i32 to vector<128x1xi32>
    %85 = arith.cmpi sge, %83, %84 : vector<128x1xi32>
    %c8_i32 = arith.constant 8 : i32
    %86 = vector.broadcast %c8_i32 : i32 to vector<128x1xi32>
    %87 = arith.cmpi sle, %83, %86 : vector<128x1xi32>
    %88 = arith.andi %85, %87 : vector<128x1xi1>
    %cst_44 = arith.constant 0.000000e+00 : f32
    %89 = vector.shape_cast %88 : vector<128x1xi1> to vector<128x1xi1>
    %90 = vector.broadcast %89 : vector<128x1xi1> to vector<128x128xi1>
    %91 = vector.broadcast %cst_44 : f32 to vector<128x128xf32>
    %92 = arith.select %90, %66, %91 : vector<128x128xi1>, vector<128x128xf32>
    %cst_45 = arith.constant 0.000000e+00 : f32
    %93 = vector.broadcast %cst_45 : f32 to vector<16x128xf32>
    %c0_46 = arith.constant 0 : index
    %c0_47 = arith.constant 0 : index
    %94 = vector.load %arg8[%c0_46, %c0_47] : memref<160x128xf32, #tpu.memory_space<vmem>>, vector<16x128xf32>
    tpu.vector_store %arg8[%c0_46, %c0_47], %93 {strides = array<i32>} : memref<160x128xf32, #tpu.memory_space<vmem>>, vector<16x128xf32>,
    %cst_48 = arith.constant 0.000000e+00 : f32
    %95 = vector.broadcast %cst_48 : f32 to vector<16x128xf32>
    %c144 = arith.constant 144 : index
    %c0_49 = arith.constant 0 : index
    %96 = vector.load %arg8[%c144, %c0_49] : memref<160x128xf32, #tpu.memory_space<vmem>>, vector<16x128xf32>
    tpu.vector_store %arg8[%c144, %c0_49], %95 {strides = array<i32>} : memref<160x128xf32, #tpu.memory_space<vmem>>, vector<16x128xf32>,
    %c16 = arith.constant 16 : index
    %c0_50 = arith.constant 0 : index
    %97 = vector.load %arg8[%c16, %c0_50] : memref<160x128xf32, #tpu.memory_space<vmem>>, vector<128x128xf32>
    tpu.vector_store %arg8[%c16, %c0_50], %92 {strides = array<i32>} : memref<160x128xf32, #tpu.memory_space<vmem>>, vector<128x128xf32>,
    %c0_51 = arith.constant 0 : index
    %c0_52 = arith.constant 0 : index
    %98 = vector.load %arg8[%c0_51, %c0_52] : memref<160x128xf32, #tpu.memory_space<vmem>>, vector<160x128xf32>
    %c1_i32_53 = arith.constant 1 : i32
    %99 = tpu.dynamic_rotate %98 by %c1_i32_53 dim 0 : vector<160x128xf32>, i32 -> vector<160x128xf32>
    %100 = arith.truncf %99 : vector<160x128xf32> to vector<160x128xbf16>
    %101 = arith.truncf %98 : vector<160x128xf32> to vector<160x128xbf16>
    %c159_i32_54 = arith.constant 159 : i32
    %102 = tpu.dynamic_rotate %98 by %c159_i32_54 dim 0 : vector<160x128xf32>, i32 -> vector<160x128xf32>
    %103 = arith.truncf %102 : vector<160x128xf32> to vector<160x128xbf16>
    %cst_55 = arith.constant 0.000000e+00 : f32
    %104 = vector.broadcast %cst_55 : f32 to vector<128x128xf32>
    %105 = vector.extract_strided_slice %100 {offsets = [0, 0], sizes = [128, 128], strides = [1, 1]} : vector<160x128xbf16> to vector<128x128xbf16>
    %c0_56 = arith.constant 0 : index
    %c0_57 = arith.constant 0 : index
    %c0_58 = arith.constant 0 : index
    %106 = vector.load %arg5[%c0_56, %c0_57, %c0_58] : memref<9x128x128xbf16, #tpu.memory_space<vmem>>, vector<1x128x128xbf16>
    %107 = vector.shape_cast %106 : vector<1x128x128xbf16> to vector<128x128xbf16>
    %cst_59 = arith.constant dense<0.000000e+00> : vector<128x128xf32>
    %108 = tpu.matmul %105, %107, %cst_59 {dimension_numbers = #tpu.dot_dimension_numbers<[1], [0], [0], [1], [0, 0, 1, 1], [], []>} : vector<128x128xbf16>, vector<128x128xbf16>, vector<128x128xf32> -> vector<128x128xf32>
    %109 = arith.addf %104, %108 : vector<128x128xf32>
    %110 = vector.extract_strided_slice %101 {offsets = [0, 0], sizes = [128, 128], strides = [1, 1]} : vector<160x128xbf16> to vector<128x128xbf16>
    %c1_60 = arith.constant 1 : index
    %c0_61 = arith.constant 0 : index
    %c0_62 = arith.constant 0 : index
    %111 = vector.load %arg5[%c1_60, %c0_61, %c0_62] : memref<9x128x128xbf16, #tpu.memory_space<vmem>>, vector<1x128x128xbf16>
    %112 = vector.shape_cast %111 : vector<1x128x128xbf16> to vector<128x128xbf16>
    %cst_63 = arith.constant dense<0.000000e+00> : vector<128x128xf32>
    %113 = tpu.matmul %110, %112, %cst_63 {dimension_numbers = #tpu.dot_dimension_numbers<[1], [0], [0], [1], [0, 0, 1, 1], [], []>} : vector<128x128xbf16>, vector<128x128xbf16>, vector<128x128xf32> -> vector<128x128xf32>
    %114 = arith.addf %109, %113 : vector<128x128xf32>
    %115 = vector.extract_strided_slice %103 {offsets = [0, 0], sizes = [128, 128], strides = [1, 1]} : vector<160x128xbf16> to vector<128x128xbf16>
    %c2_64 = arith.constant 2 : index
    %c0_65 = arith.constant 0 : index
    %c0_66 = arith.constant 0 : index
    %116 = vector.load %arg5[%c2_64, %c0_65, %c0_66] : memref<9x128x128xbf16, #tpu.memory_space<vmem>>, vector<1x128x128xbf16>
    %117 = vector.shape_cast %116 : vector<1x128x128xbf16> to vector<128x128xbf16>
    %cst_67 = arith.constant dense<0.000000e+00> : vector<128x128xf32>
    %118 = tpu.matmul %115, %117, %cst_67 {dimension_numbers = #tpu.dot_dimension_numbers<[1], [0], [0], [1], [0, 0, 1, 1], [], []>} : vector<128x128xbf16>, vector<128x128xbf16>, vector<128x128xf32> -> vector<128x128xf32>
    %119 = arith.addf %114, %118 : vector<128x128xf32>
    %120 = vector.extract_strided_slice %100 {offsets = [16, 0], sizes = [128, 128], strides = [1, 1]} : vector<160x128xbf16> to vector<128x128xbf16>
    %c3_68 = arith.constant 3 : index
    %c0_69 = arith.constant 0 : index
    %c0_70 = arith.constant 0 : index
    %121 = vector.load %arg5[%c3_68, %c0_69, %c0_70] : memref<9x128x128xbf16, #tpu.memory_space<vmem>>, vector<1x128x128xbf16>
    %122 = vector.shape_cast %121 : vector<1x128x128xbf16> to vector<128x128xbf16>
    %cst_71 = arith.constant dense<0.000000e+00> : vector<128x128xf32>
    %123 = tpu.matmul %120, %122, %cst_71 {dimension_numbers = #tpu.dot_dimension_numbers<[1], [0], [0], [1], [0, 0, 1, 1], [], []>} : vector<128x128xbf16>, vector<128x128xbf16>, vector<128x128xf32> -> vector<128x128xf32>
    %124 = arith.addf %119, %123 : vector<128x128xf32>
    %125 = vector.extract_strided_slice %101 {offsets = [16, 0], sizes = [128, 128], strides = [1, 1]} : vector<160x128xbf16> to vector<128x128xbf16>
    %c4_72 = arith.constant 4 : index
    %c0_73 = arith.constant 0 : index
    %c0_74 = arith.constant 0 : index
    %126 = vector.load %arg5[%c4_72, %c0_73, %c0_74] : memref<9x128x128xbf16, #tpu.memory_space<vmem>>, vector<1x128x128xbf16>
    %127 = vector.shape_cast %126 : vector<1x128x128xbf16> to vector<128x128xbf16>
    %cst_75 = arith.constant dense<0.000000e+00> : vector<128x128xf32>
    %128 = tpu.matmul %125, %127, %cst_75 {dimension_numbers = #tpu.dot_dimension_numbers<[1], [0], [0], [1], [0, 0, 1, 1], [], []>} : vector<128x128xbf16>, vector<128x128xbf16>, vector<128x128xf32> -> vector<128x128xf32>
    %129 = arith.addf %124, %128 : vector<128x128xf32>
    %130 = vector.extract_strided_slice %103 {offsets = [16, 0], sizes = [128, 128], strides = [1, 1]} : vector<160x128xbf16> to vector<128x128xbf16>
    %c5_76 = arith.constant 5 : index
    %c0_77 = arith.constant 0 : index
    %c0_78 = arith.constant 0 : index
    %131 = vector.load %arg5[%c5_76, %c0_77, %c0_78] : memref<9x128x128xbf16, #tpu.memory_space<vmem>>, vector<1x128x128xbf16>
    %132 = vector.shape_cast %131 : vector<1x128x128xbf16> to vector<128x128xbf16>
    %cst_79 = arith.constant dense<0.000000e+00> : vector<128x128xf32>
    %133 = tpu.matmul %130, %132, %cst_79 {dimension_numbers = #tpu.dot_dimension_numbers<[1], [0], [0], [1], [0, 0, 1, 1], [], []>} : vector<128x128xbf16>, vector<128x128xbf16>, vector<128x128xf32> -> vector<128x128xf32>
    %134 = arith.addf %129, %133 : vector<128x128xf32>
    %135 = vector.extract_strided_slice %100 {offsets = [32, 0], sizes = [128, 128], strides = [1, 1]} : vector<160x128xbf16> to vector<128x128xbf16>
    %c6_80 = arith.constant 6 : index
    %c0_81 = arith.constant 0 : index
    %c0_82 = arith.constant 0 : index
    %136 = vector.load %arg5[%c6_80, %c0_81, %c0_82] : memref<9x128x128xbf16, #tpu.memory_space<vmem>>, vector<1x128x128xbf16>
    %137 = vector.shape_cast %136 : vector<1x128x128xbf16> to vector<128x128xbf16>
    %cst_83 = arith.constant dense<0.000000e+00> : vector<128x128xf32>
    %138 = tpu.matmul %135, %137, %cst_83 {dimension_numbers = #tpu.dot_dimension_numbers<[1], [0], [0], [1], [0, 0, 1, 1], [], []>} : vector<128x128xbf16>, vector<128x128xbf16>, vector<128x128xf32> -> vector<128x128xf32>
    %139 = arith.addf %134, %138 : vector<128x128xf32>
    %140 = vector.extract_strided_slice %101 {offsets = [32, 0], sizes = [128, 128], strides = [1, 1]} : vector<160x128xbf16> to vector<128x128xbf16>
    %c7_84 = arith.constant 7 : index
    %c0_85 = arith.constant 0 : index
    %c0_86 = arith.constant 0 : index
    %141 = vector.load %arg5[%c7_84, %c0_85, %c0_86] : memref<9x128x128xbf16, #tpu.memory_space<vmem>>, vector<1x128x128xbf16>
    %142 = vector.shape_cast %141 : vector<1x128x128xbf16> to vector<128x128xbf16>
    %cst_87 = arith.constant dense<0.000000e+00> : vector<128x128xf32>
    %143 = tpu.matmul %140, %142, %cst_87 {dimension_numbers = #tpu.dot_dimension_numbers<[1], [0], [0], [1], [0, 0, 1, 1], [], []>} : vector<128x128xbf16>, vector<128x128xbf16>, vector<128x128xf32> -> vector<128x128xf32>
    %144 = arith.addf %139, %143 : vector<128x128xf32>
    %145 = vector.extract_strided_slice %103 {offsets = [32, 0], sizes = [128, 128], strides = [1, 1]} : vector<160x128xbf16> to vector<128x128xbf16>
    %c8_88 = arith.constant 8 : index
    %c0_89 = arith.constant 0 : index
    %c0_90 = arith.constant 0 : index
    %146 = vector.load %arg5[%c8_88, %c0_89, %c0_90] : memref<9x128x128xbf16, #tpu.memory_space<vmem>>, vector<1x128x128xbf16>
    %147 = vector.shape_cast %146 : vector<1x128x128xbf16> to vector<128x128xbf16>
    %cst_91 = arith.constant dense<0.000000e+00> : vector<128x128xf32>
    %148 = tpu.matmul %145, %147, %cst_91 {dimension_numbers = #tpu.dot_dimension_numbers<[1], [0], [0], [1], [0, 0, 1, 1], [], []>} : vector<128x128xbf16>, vector<128x128xbf16>, vector<128x128xf32> -> vector<128x128xf32>
    %149 = arith.addf %144, %148 : vector<128x128xf32>
    %cst_92 = arith.constant 0.000000e+00 : f32
    %150 = vector.broadcast %cst_92 : f32 to vector<128x128xf32>
    %151 = arith.maximumf %149, %150 : vector<128x128xf32>
    %152 = arith.truncf %151 : vector<128x128xf32> to vector<128x128xbf16>
    %c0_93 = arith.constant 0 : index
    %c0_94 = arith.constant 0 : index
    %153 = vector.load %arg6[%c0_93, %c0_94] : memref<128x128xbf16, #tpu.memory_space<vmem>>, vector<128x128xbf16>
    %cst_95 = arith.constant dense<0.000000e+00> : vector<128x128xf32>
    %154 = tpu.matmul %152, %153, %cst_95 {dimension_numbers = #tpu.dot_dimension_numbers<[1], [0], [0], [1], [0, 0, 1, 1], [], []>} : vector<128x128xbf16>, vector<128x128xbf16>, vector<128x128xf32> -> vector<128x128xf32>
    %cst_96 = arith.constant 0.000000e+00 : f32
    %155 = vector.broadcast %cst_96 : f32 to vector<128x128xf32>
    %156 = arith.maximumf %154, %155 : vector<128x128xf32>
    %157 = arith.truncf %156 : vector<128x128xf32> to vector<128x128xbf16>
    %158 = vector.shape_cast %157 : vector<128x128xbf16> to vector<1x128x128xbf16>
    %c0_97 = arith.constant 0 : index
    %c0_98 = arith.constant 0 : index
    %c0_99 = arith.constant 0 : index
    %159 = vector.load %arg7[%c0_97, %c0_98, %c0_99] : memref<1x128x128xbf16, #tpu.memory_space<vmem>>, vector<1x128x128xbf16>
    tpu.vector_store %arg7[%c0_97, %c0_98, %c0_99], %158 {strides = array<i32>} : memref<1x128x128xbf16, #tpu.memory_space<vmem>>, vector<1x128x128xbf16>,
    return
  }
  func.func @transform_0(%arg0: i32) -> (i32, i32, i32) {
    %c0_i32 = arith.constant 0 : i32
    %c0_i32_0 = arith.constant 0 : i32
    %c0_i32_1 = arith.constant 0 : i32
    return %arg0, %c0_i32, %c0_i32_0 : i32, i32, i32
  }
  func.func @transform_1(%arg0: i32) -> (i32, i32) {
    %c0_i32 = arith.constant 0 : i32
    %c0_i32_0 = arith.constant 0 : i32
    %c0_i32_1 = arith.constant 0 : i32
    return %c0_i32, %c0_i32_0 : i32, i32
  }
  func.func @transform_2(%arg0: i32) -> (i32, i32, i32) {
    %c0_i32 = arith.constant 0 : i32
    %c0_i32_0 = arith.constant 0 : i32
    %c0_i32_1 = arith.constant 0 : i32
    %c0_i32_2 = arith.constant 0 : i32
    return %c0_i32, %c0_i32_0, %c0_i32_1 : i32, i32, i32
  }
  func.func @transform_3(%arg0: i32) -> (i32, i32) {
    %c0_i32 = arith.constant 0 : i32
    %c0_i32_0 = arith.constant 0 : i32
    %c0_i32_1 = arith.constant 0 : i32
    return %c0_i32, %c0_i32_0 : i32, i32
  }
  func.func @transform_4(%arg0: i32) -> (i32, i32, i32) {
    %c0_i32 = arith.constant 0 : i32
    %c0_i32_0 = arith.constant 0 : i32
    %c0_i32_1 = arith.constant 0 : i32
    %c0_i32_2 = arith.constant 0 : i32
    return %c0_i32, %c0_i32_0, %c0_i32_1 : i32, i32, i32
  }
  func.func @transform_5(%arg0: i32) -> (i32, i32) {
    %c0_i32 = arith.constant 0 : i32
    %c0_i32_0 = arith.constant 0 : i32
    %c0_i32_1 = arith.constant 0 : i32
    return %c0_i32, %c0_i32_0 : i32, i32
  }
  func.func @transform_6(%arg0: i32) -> (i32, i32, i32) {
    %c0_i32 = arith.constant 0 : i32
    %c0_i32_0 = arith.constant 0 : i32
    %c0_i32_1 = arith.constant 0 : i32
    return %arg0, %c0_i32, %c0_i32_0 : i32, i32, i32
  }
}

</mosaic_0001>

<bundles_post_ra>
// kernel: bottleneck_forward.1
= control target key start
LH: loop header
LB: loop body
LE: loop exit
PB: predicated region body
PF: predicated region fallthrough
CT: control target
= control target key end

     0   :  { %s6914_s21 = smov 0   ;;  %s8383_s0 = inlined_call_operand.vmem [shape: bf16[2,160,128], index: 0, kind: input, shape index: {}]   ;;  %s8384_s1 = inlined_call_operand.vmem [shape: bf16[128,128], index: 1, kind: input, shape index: {}]   ;;  %s8385_s2 = inlined_call_operand.vmem [shape: bf16[9,128,128], index: 2, kind: input, shape index: {}]   ;;  %s8386_s3 = inlined_call_operand.vmem [shape: bf16[128,128], index: 3, kind: input, shape index: {}]   ;;  %s8387_s4 = inlined_call_operand.vmem [shape: bf16[9,128,128], index: 4, kind: input, shape index: {}]   ;;  %s8388_s5 = inlined_call_operand.vmem [shape: bf16[128,128], index: 5, kind: input, shape index: {}]   ;;  %s8389_s6 = inlined_call_operand.vmem [shape: bf16[2,128,128], index: 6, kind: output, shape index: {}]  }
   0x1 LB: > { %s4788_s22 = sadd.s32 4294967295, %s6875_s21   ;;  %p4792_p0 = scmp.ge.s32.totalorder %s6875_s21, 1  ;;  %s6875_s21 = sphi %s6914_s21, %s16_s21  }
   0x2   : > { %p212_p1 = scmp.lt.s32.totalorder %s6875_s21, 3 }
   0x4   : > { %p213_p2 = pnand %p4792_p0, %p212_p1 }
   0x5   : > { %v6675_v0 = vld [vmem:[%s8384_s1] sm:$0xff] (!%p213_p2)   ;;  %p242_p3 = scmp.lt.s32.totalorder (!%p213_p2), %s4788_s22, 1  ;;  %v6676_v1 = vld [vmem:[%s8384_s1 + $0x8] sm:$0xff] (!%p213_p2)   ;;  %v6677_v2 = vld [vmem:[%s8384_s1 + $0x10] sm:$0xff] (!%p213_p2)   ;;  %v550_v27 = vlaneseq (!%p213_p2) }
   0x6   : > { %216 = sbr.rel (%p213_p2) target bundleno = 1677 (0x68d), region = 44  ;;  %5716 = vmatprep.subr.bf16.mxu0 (!%p213_p2), %v6675_v0  ;;  %6392 = vmatprep.subr.bf16.mxu1 (!%p213_p2), %v6675_v0  ;;  %v6678_v3 = vld [vmem:[%s8384_s1 + $0x18] sm:$0xff] (!%p213_p2)   ;;  %v6679_v6 = vld [vmem:[%s8384_s1 + $0x20] sm:$0xff] (!%p213_p2)   ;;  %v6680_v7 = vld [vmem:[%s8384_s1 + $0x28] sm:$0xff] (!%p213_p2)  }
   0x7   : > { %5717 = vmatpush3.bf16.msra.mxu0 (!%p213_p2), %v6675_v0  ;;  %6400 = vmatpush3.bf16.msra.mxu1 (!%p213_p2), %v6675_v0  ;;  %v6681_v8 = vld [vmem:[%s8384_s1 + $0x30] sm:$0xff] (!%p213_p2)   ;;  %v6682_v9 = vld [vmem:[%s8384_s1 + $0x38] sm:$0xff] (!%p213_p2)   ;;  %v6693_v12 = vld [vmem:[%s8385_s2 + $0x40] sm:$0xff] (!%p213_p2)   ;;  %v6991_v30 = vshrl.u32 (!%p213_p2), %v550_v27, 7 }
   0x8   : > { %5718 = vmatprep.subr.bf16.mxu0 (!%p213_p2), %v6676_v1  ;;  %6393 = vmatprep.subr.bf16.mxu1 (!%p213_p2), %v6676_v1  ;;  %v6694_v14 = vld [vmem:[%s8385_s2 + $0x48] sm:$0xff] (!%p213_p2)   ;;  %v6695_v17 = vld [vmem:[%s8385_s2 + $0x50] sm:$0xff] (!%p213_p2)   ;;  %v6696_v18 = vld [vmem:[%s8385_s2 + $0x58] sm:$0xff] (!%p213_p2)  }
   0x9   : > { %v6697_v21 = vld [vmem:[%s8385_s2 + $0x60] sm:$0xff] (!%p213_p2)   ;;  %v6698_v22 = vld [vmem:[%s8385_s2 + $0x68] sm:$0xff] (!%p213_p2)   ;;  %v6699_v24 = vld [vmem:[%s8385_s2 + $0x70] sm:$0xff] (!%p213_p2)   ;;  %vm552_vm0 = vcmp.lt.s32.totalorder (!%p213_p2), %v6991_v30, 1  ;;  %vm8394_vm1 = vcmp.lt.s32.totalorder (!%p213_p2), %v6991_v30, 7 }
   0xa   : > { %v6700_v25 = vld [vmem:[%s8385_s2 + $0x78] sm:$0xff] (!%p213_p2)   ;;  %v6701_v26 = vld [vmem:[%s8385_s2] sm:$0xff] (!%p213_p2)  }
   0xb   : > { %5719 = vmatpush3.bf16.msra.mxu0 (!%p213_p2), %v6676_v1  ;;  %6401 = vmatpush3.bf16.msra.mxu1 (!%p213_p2), %v6676_v1  ;;  %v6702_v1 = vld [vmem:[%s8385_s2 + $0x8] sm:$0xff] (!%p213_p2)  }
   0xc   : > { %5720 = vmatprep.subr.bf16.mxu0 (!%p213_p2), %v6677_v2  ;;  %6394 = vmatprep.subr.bf16.mxu1 (!%p213_p2), %v6677_v2 }
   0xd   : > { %s8457_s22 = smov (!%p242_p3, %s4788_s22), 1 }
   0xe   : > { %s6664_s29 = smul.u32 80, %s8457_s22  ;;  %s5248_s17 = sshll.u32 %s8457_s22, 6 }
   0xf   : > { %5721 = vmatpush3.bf16.msra.mxu0 %v6677_v2  ;;  %6402 = vmatpush3.bf16.msra.mxu1 %v6677_v2  ;;  %s8370_s20 = scalar_lea.vmem %s8389_s6, %s5248_s17 }
  0x10   : > { %s6937_s8 = scalar_lea.vmem %s8383_s0, %s6664_s29  ;;  %5722 = vmatprep.subr.bf16.mxu0 %v6678_v3  ;;  %6395 = vmatprep.subr.bf16.mxu1 %v6678_v3 }
  0x11   : > { %v6683_v4 = vld [vmem:[%s6937_s8] sm:$0xff]   ;;  %v255_v10 = vld [vmem:[%s6937_s8 + $0x8] sm:$0xff]   ;;  %v257_v11 = vld [vmem:[%s6937_s8 + $0x10] sm:$0xff]  }
  0x12   : > { %v269_v5 = vld [vmem:[%s6937_s8 + $0x40] sm:$0xff]   ;;  %5732 = vmatprep.mubr.bf16.mxu0 %v6683_v4  ;;  %v6686_v13 = vld [vmem:[%s6937_s8 + $0x48] sm:$0xff]   ;;  %v259_v15 = vld [vmem:[%s6937_s8 + $0x18] sm:$0xff]  }
  0x13   : > { %5748 = vmatprep.mubr.bf16.mxu1 %v269_v5  ;;  %5723 = vmatpush3.bf16.msra.mxu0 %v6678_v3  ;;  %v261_v16 = vld [vmem:[%s6937_s8 + $0x20] sm:$0xff]   ;;  %v263_v19 = vld [vmem:[%s6937_s8 + $0x28] sm:$0xff]   ;;  %v265_v20 = vld [vmem:[%s6937_s8 + $0x30] sm:$0xff]  }
  0x14   : > { %6403 = vmatpush3.bf16.msra.mxu1 %v6678_v3  ;;  %5724 = vmatprep.subr.bf16.mxu0 %v6679_v6  ;;  %v267_v23 = vld [vmem:[%s6937_s8 + $0x38] sm:$0xff]  }
  0x15   : > { %6396 = vmatprep.subr.bf16.mxu1 %v6679_v6 }
  0x17   : > { %5725 = vmatpush3.bf16.msra.mxu0 %v6679_v6 }
  0x18   : > { %6404 = vmatpush3.bf16.msra.mxu1 %v6679_v6  ;;  %5726 = vmatprep.subr.bf16.mxu0 %v6680_v7 }
  0x19   : > { %6397 = vmatprep.subr.bf16.mxu1 %v6680_v7 }
  0x1b   : > { %5727 = vmatpush3.bf16.msra.mxu0 %v6680_v7 }
  0x1c   : > { %6405 = vmatpush3.bf16.msra.mxu1 %v6680_v7  ;;  %5728 = vmatprep.subr.bf16.mxu0 %v6681_v8 }
  0x1d   : > { %6398 = vmatprep.subr.bf16.mxu1 %v6681_v8 }
  0x1f   : > { %5729 = vmatpush3.bf16.msra.mxu0 %v6681_v8 }
  0x20   : > { %6406 = vmatpush3.bf16.msra.mxu1 %v6681_v8  ;;  %5730 = vmatprep.subr.bf16.mxu0 %v6682_v9 }
  0x21   : > { %6399 = vmatprep.subr.bf16.mxu1 %v6682_v9 }
  0x23   : > { %5731 = vmatpush3.bf16.msra.mxu0 %v6682_v9 }
  0x24   : > { %6407 = vmatpush3.bf16.msra.mxu1 %v6682_v9 }
  0x25   : > { %5752 = vmatprep.subr.bf16.mxu1 %v6693_v12 }
  0x26   : > { %5733 = vmatmul.mubr.bf16.vlgmr.msra.gmra.mrb[0].mxu0 %v255_v10 }
  0x27   : > { %5749 = vmatmul.mubr.bf16.vlgmr.msra.gmra.mrb[0].mxu1 %v6686_v13  ;;  %5736 = vmatprep.mubr.bf16.mxu0 %v257_v11 }
  0x28   : > { %5753 = vmatpush3.bf16.msra.mxu1 %v6693_v12 }
  0x29   : > { %5754 = vmatprep.subr.bf16.mxu1 %v6694_v14 }
  0x2c   : > { %5755 = vmatpush3.bf16.msra.mxu1 %v6694_v14 }
  0x2d   : > { %5756 = vmatprep.subr.bf16.mxu1 %v6695_v17 }
  0x2e   : > { %5737 = vmatmul.mubr.bf16.gmra.mrb[4].mxu0 %v259_v15 }
  0x2f   : > { %5740 = vmatprep.mubr.bf16.mxu0 %v261_v16 }
  0x30   : > { %5757 = vmatpush3.bf16.msra.mxu1 %v6695_v17 }
  0x31   : > { %5758 = vmatprep.subr.bf16.mxu1 %v6696_v18 }
  0x34   : > { %5759 = vmatpush3.bf16.msra.mxu1 %v6696_v18  ;;  %v6703_v18 = vld [vmem:[%s8385_s2 + $0x10] sm:$0xff]  }
  0x35   : > { %5760 = vmatprep.subr.bf16.mxu1 %v6697_v21 }
  0x36   : > { %5741 = vmatmul.mubr.bf16.gmra.mrb[8].mxu0 %v263_v19 }
  0x37   : > { %5744 = vmatprep.mubr.bf16.mxu0 %v265_v20 }
  0x38   : > { %5761 = vmatpush3.bf16.msra.mxu1 %v6697_v21 }
  0x39   : > { %5762 = vmatprep.subr.bf16.mxu1 %v6698_v22 }
  0x3c   : > { %5763 = vmatpush3.bf16.msra.mxu1 %v6698_v22 }
  0x3d   : > { %5764 = vmatprep.subr.bf16.mxu1 %v6699_v24 }
  0x3e   : > { %5745 = vmatmul.mubr.bf16.gmra.mrb[12].mxu0 %v267_v23 }
  0x40   : > { %5765 = vmatpush3.bf16.msra.mxu1 %v6699_v24 }
  0x41   : > { %5766 = vmatprep.subr.bf16.mxu1 %v6700_v25 }
  0x44   : > { %5767 = vmatpush3.bf16.msra.mxu1 %v6700_v25 }
  0x45   : > { %5784 = vmatprep.subr.bf16.mxu1 %v6701_v26 }
  0xf9   : > { %v5734_v28 = vpop.f32.mrb[0].mxu0 }
  0xfa   : > { %v5750_v29 = vpop.f32.mrb[0].mxu1  ;;  %v6993_v31 = vmax.f32 %v5734_v28, 0.0  ;;  %v431_v32 = vpop.f32.mrb[1].mxu0 }
  0xfb   : > { %v495_v33 = vpop.f32.mrb[1].mxu1  ;;  %v6995_v34 = vmax.f32 %v5750_v29, 0.0  ;;  %v6997_v35 = vmax.f32 %v431_v32, 0.0  ;;  %v5735_v36 = vpop.f32.mrb[2].mxu0 }
  0xfc   : > { %v5751_v37 = vpop.f32.mrb[2].mxu1  ;;  %v6999_v38 = vmax.f32 %v495_v33, 0.0  ;;  %v434_v39 = vpop.f32.mrb[3].mxu0  ;;  %v532_v41 = vrot.slane %v6993_v31, 7  ;;  %v595_v42 = vrot.slane %v6993_v31, 1  ;;  %v513_v44 = vmax.f32 %v5735_v36, 0.0 }
  0xfd   : > { %v498_v40 = vpop.f32.mrb[3].mxu1  ;;  %v548_v43 = vrot.slane %v6995_v34, 7  ;;  %v7006_v45 = vmax.f32 %v5751_v37, 0.0  ;;  %v511_v46 = vmax.f32 %v434_v39, 0.0  ;;  %v611_v47 = vrot.slane %v6995_v34, 1 }
  0xfe   : > { %v530_v48 = vrot.slane %v6997_v35, 7  ;;  %v593_v49 = vrot.slane %v6997_v35, 1  ;;  %v7011_v50 = vmax.f32 %v498_v40, 0.0  ;;  %v546_v51 = vrot.slane %v6999_v38, 7  ;;  %v6704_v40 = vld [vmem:[%s8385_s2 + $0x18] sm:$0xff]  }
  0xff   : > { %v533_v52 = vrot.slane %v513_v44, 7  ;;  %v7015_v53 = vpack.c.bf16 %v513_v44, %v6993_v31  ;;  %v596_v54 = vrot.slane %v513_v44, 1  ;;  %v609_v55 = vrot.slane %v6999_v38, 1 }
 0x100   : > { %v549_v56 = vrot.slane %v7006_v45, 7  ;;  %v531_v57 = vrot.slane %v511_v46, 7  ;;  %v583_v59 = vpack.c.bf16 %v511_v46, %v6997_v35  ;;  %v594_v62 = vrot.slane %v511_v46, 1  ;;  %v6710_v35 = vld [vmem:[%s8385_s2 + $0x88] sm:$0xff]  }
 0x101   : > { %v5738_v58 = vpop.f32.mrb[4].mxu0  ;;  %v569_v60 = vsel %vm552_vm0, %v532_v41, %v533_v52  ;;  %v630_v61 = vsel %vm8394_vm1, %v595_v42, %v596_v54  ;;  %v547_v5 = vrot.slane %v7011_v50, 7  ;;  %v610_v11 = vrot.slane %v7011_v50, 1 }
 0x102   : > { %v516_v63 = vmax.f32 %v5738_v58, 0.0  ;;  %v447_v0 = vpop.f32.mrb[5].mxu0  ;;  %v570_v2 = vsel %vm552_vm0, %v531_v57, %v532_v41  ;;  %5768 = vmatprep.mubr.bf16.mxu1 %v583_v59  ;;  %v7032_v6 = vsel %vm552_vm0, %v530_v48, %v531_v57  ;;  %v7044_v15 = vsel %vm552_vm0, %v549_v56, %v530_v48 }
 0x103   : > { %v514_v3 = vmax.f32 %v447_v0, 0.0  ;;  %v5739_v4 = vpop.f32.mrb[6].mxu0  ;;  %v7034_v7 = vpack.c.bf16 %v569_v60, %v570_v2  ;;  %5769 = vmatmul.mubr.bf16.vlgmr.msra.gmra.mrb[4].mxu1 %v7015_v53  ;;  %v573_v20 = vpack.c.bf16 %v7032_v6, %v7044_v15  ;;  %v7068_v28 = vsel %vm8394_vm1, %v594_v62, %v595_v42  ;;  %v6712_v6 = vld [vmem:[%s8385_s2 + $0x98] sm:$0xff]   ;;  %v6713_v15 = vld [vmem:[%s8385_s2 + $0xa0] sm:$0xff]  }
 0x104   : > { %v536_v8 = vrot.slane %v516_v63, 7  ;;  %v7037_v9 = vmax.f32 %v5739_v4, 0.0  ;;  %v450_v10 = vpop.f32.mrb[7].mxu0  ;;  %5785 = vmatpush3.bf16.msra.mxu1 %v6701_v26  ;;  %v599_v29 = vrot.slane %v516_v63, 1  ;;  %v7079_v36 = vsel %vm8394_vm1, %v593_v49, %v594_v62 }
 0x105   : > { %v534_v12 = vrot.slane %v514_v3, 7  ;;  %v597_v13 = vrot.slane %v514_v3, 1  ;;  %v515_v14 = vmax.f32 %v450_v10, 0.0  ;;  %5786 = vmatprep.subr.bf16.mxu1 %v6702_v1  ;;  %v634_v44 = vpack.c.bf16 %v7068_v28, %v7079_v36  ;;  %v6719_v28 = vld [vmem:[%s8385_s2 + $0xd0] sm:$0xff]   ;;  %v6720_v36 = vld [vmem:[%s8385_s2 + $0xd8] sm:$0xff]  }
 0x106   : > { %v537_v16 = vrot.slane %v7037_v9, 7  ;;  %v600_v17 = vrot.slane %v7037_v9, 1  ;;  %v7052_v19 = vpack.c.bf16 %v7037_v9, %v516_v63  ;;  %v7107_v2 = vsel %vm552_vm0, %v546_v51, %v547_v5 }
 0x107   : > { %v629_v21 = vsel %vm8394_vm1, %v596_v54, %v597_v13  ;;  %v535_v22 = vrot.slane %v515_v14, 7  ;;  %v598_v23 = vrot.slane %v515_v14, 1  ;;  %v7058_v24 = vpack.c.bf16 %v515_v14, %v514_v3 }
 0x108   : > { %v7060_v25 = vpack.c.bf16 %v629_v21, %v630_v61  ;;  %v568_v26 = vsel %vm552_vm0, %v533_v52, %v534_v12  ;;  %v565_v27 = vsel %vm552_vm0, %v536_v8, %v537_v16  ;;  %5787 = vmatpush3.bf16.msra.mxu1 %v6702_v1  ;;  %v626_v57 = vsel %vm8394_vm1, %v599_v29, %v600_v17 }
 0x109   : > { %v5742_v31 = vpop.f32.mrb[8].mxu0  ;;  %5772 = vmatprep.mubr.bf16.mxu1 %v7058_v24  ;;  %v567_v32 = vsel %vm552_vm0, %v534_v12, %v535_v22  ;;  %v566_v33 = vsel %vm552_vm0, %v535_v22, %v536_v8  ;;  %5788 = vmatprep.subr.bf16.mxu1 %v6703_v18  ;;  %v627_v52 = vsel %vm8394_vm1, %v598_v23, %v599_v29  ;;  %v6705_v8 = vld [vmem:[%s8385_s2 + $0x20] sm:$0xff]  }
 0x10a   : > { %v520_v37 = vmax.f32 %v5742_v31, 0.0  ;;  %v463_v39 = vpop.f32.mrb[9].mxu0  ;;  %v7084_v41 = vpack.c.bf16 %v567_v32, %v568_v26  ;;  %v7086_v42 = vpack.c.bf16 %v565_v27, %v566_v33  ;;  %v628_v54 = vsel %vm8394_vm1, %v597_v13, %v598_v23 }
 0x10b   : > { %v518_v46 = vmax.f32 %v463_v39, 0.0  ;;  %v5743_v48 = vpop.f32.mrb[10].mxu0  ;;  %5773 = vmatmul.mubr.bf16.gmra.mrb[8].mxu1 %v7052_v19  ;;  %v7099_v62 = vpack.c.bf16 %v627_v52, %v628_v54  ;;  %v7119_v10 = vpack.c.bf16 %v7011_v50, %v6999_v38  ;;  %v615_v26 = vsel %vm8394_vm1, %v610_v11, %v611_v47 }
 0x10c   : > { %v540_v58 = vrot.slane %v520_v37, 7  ;;  %v603_v59 = vrot.slane %v520_v37, 1  ;;  %v7097_v60 = vmax.f32 %v5743_v48, 0.0  ;;  %v466_v61 = vpop.f32.mrb[11].mxu0  ;;  %5789 = vmatpush3.bf16.msra.mxu1 %v6703_v18  ;;  %v612_v27 = vrot.slane %v7006_v45, 1 }
 0x10d   : > { %v538_v63 = vrot.slane %v518_v46, 7  ;;  %v601_v0 = vrot.slane %v518_v46, 1  ;;  %v519_v1 = vmax.f32 %v466_v61, 0.0  ;;  %5790 = vmatprep.subr.bf16.mxu1 %v6704_v40 }
 0x10e   : > { %v541_v3 = vrot.slane %v7097_v60, 7  ;;  %v604_v4 = vrot.slane %v7097_v60, 1  ;;  %v7115_v9 = vpack.c.bf16 %v7097_v60, %v520_v37  ;;  %v6706_v37 = vld [vmem:[%s8385_s2 + $0x28] sm:$0xff]   ;;  %v7242_v38 = vsel %vm8394_vm1, %v611_v47, %v612_v27  ;;  %v6709_v47 = vld [vmem:[%s8385_s2 + $0x80] sm:$0xff]  }
 0x10f   : > { %v539_v12 = vrot.slane %v519_v1, 7  ;;  %v602_v13 = vrot.slane %v519_v1, 1  ;;  %v7121_v14 = vpack.c.bf16 %v519_v1, %v518_v46  ;;  %v564_v18 = vsel %vm552_vm0, %v537_v16, %v538_v63 }
 0x110   : > { %v561_v21 = vsel %vm552_vm0, %v540_v58, %v541_v3  ;;  %v625_v22 = vsel %vm8394_vm1, %v600_v17, %v601_v0  ;;  %v622_v23 = vsel %vm8394_vm1, %v603_v59, %v604_v4  ;;  %5791 = vmatpush3.bf16.msra.mxu1 %v6704_v40 }
 0x111   : > { %v5746_v16 = vpop.f32.mrb[12].mxu0  ;;  %5776 = vmatprep.mubr.bf16.mxu1 %v7121_v14  ;;  %v563_v29 = vsel %vm552_vm0, %v538_v63, %v539_v12  ;;  %v562_v17 = vsel %vm552_vm0, %v539_v12, %v540_v58  ;;  %v7143_v31 = vpack.c.bf16 %v625_v22, %v626_v57  ;;  %5792 = vmatprep.subr.bf16.mxu1 %v6705_v8 }
 0x112   : > { %v524_v32 = vmax.f32 %v5746_v16, 0.0  ;;  %v479_v33 = vpop.f32.mrb[13].mxu0  ;;  %v7148_v39 = vpack.c.bf16 %v563_v29, %v564_v18  ;;  %v7150_v40 = vpack.c.bf16 %v561_v21, %v562_v17  ;;  %v623_v46 = vsel %vm8394_vm1, %v602_v13, %v603_v59 }
 0x113   : > { %v522_v48 = vmax.f32 %v479_v33, 0.0  ;;  %v5747_v52 = vpop.f32.mrb[14].mxu0  ;;  %v624_v54 = vsel %vm8394_vm1, %v601_v0, %v602_v13  ;;  %v616_v57 = vsel %vm8394_vm1, %v609_v55, %v610_v11  ;;  %v7168_v58 = vsel %vm552_vm0, %v548_v43, %v549_v56  ;;  %5777 = vmatmul.mubr.bf16.gmra.mrb[12].mxu1 %v7115_v9  ;;  %v6707_v56 = vld [vmem:[%s8385_s2 + $0x30] sm:$0xff]  }
 0x114   : > { %v544_v59 = vrot.slane %v524_v32, 7  ;;  %v607_v60 = vrot.slane %v524_v32, 1  ;;  %v525_v61 = vmax.f32 %v5747_v52, 0.0  ;;  %v482_v63 = vpop.f32.mrb[15].mxu0  ;;  %v7171_v0 = vpack.c.bf16 %v623_v46, %v624_v54  ;;  %5793 = vmatpush3.bf16.msra.mxu1 %v6705_v8 }
 0x115   : > { %v542_v1 = vrot.slane %v522_v48, 7  ;;  %v605_v12 = vrot.slane %v522_v48, 1  ;;  %v523_v11 = vmax.f32 %v482_v63, 0.0  ;;  %v7173_v13 = vpack.c.bf16 %v615_v26, %v616_v57  ;;  %5794 = vmatprep.subr.bf16.mxu1 %v6706_v37  ;;  %v6716_v63 = vld [vmem:[%s8385_s2 + $0xb8] sm:$0xff]  }
 0x116   : > { %v545_v18 = vrot.slane %v525_v61, 7  ;;  %v608_v21 = vrot.slane %v525_v61, 1  ;;  %v7178_v22 = vpack.c.bf16 %v525_v61, %v524_v32  ;;  %v7186_v16 = vsel %vm552_vm0, %v547_v5, %v548_v43 }
 0x117   : > { %v543_v8 = vrot.slane %v523_v11, 7  ;;  %v606_v26 = vrot.slane %v523_v11, 1  ;;  %v7188_v29 = vpack.c.bf16 %v523_v11, %v522_v48  ;;  %v560_v17 = vsel %vm552_vm0, %v541_v3, %v542_v1  ;;  %v6722_v11 = vld [vmem:[%s8385_s2 + $0xe8] sm:$0xff]  }
 0x118   : > { %v557_v33 = vsel %vm552_vm0, %v544_v59, %v545_v18  ;;  %v621_v32 = vsel %vm8394_vm1, %v604_v4, %v605_v12  ;;  %v617_v50 = vsel %vm8394_vm1, %v608_v21, %v609_v55  ;;  %v618_v43 = vsel %vm8394_vm1, %v607_v60, %v608_v21  ;;  %5795 = vmatpush3.bf16.msra.mxu1 %v6706_v37  ;;  %v6708_v4 = vld [vmem:[%s8385_s2 + $0x38] sm:$0xff]  }
 0x119   : > { %5780 = vmatprep.mubr.bf16.mxu1 %v7188_v29  ;;  %v559_v5 = vsel %vm552_vm0, %v542_v1, %v543_v8  ;;  %v558_v3 = vsel %vm552_vm0, %v543_v8, %v544_v59  ;;  %v7207_v46 = vpack.c.bf16 %v621_v32, %v622_v23  ;;  %5796 = vmatprep.subr.bf16.mxu1 %v6707_v56  ;;  %v6717_v1 = vld [vmem:[%s8385_s2 + $0xc0] sm:$0xff]   ;;  %v6724_v21 = vld [vmem:[%s8385_s2 + $0xf8] sm:$0xff]   ;;  %v6726_v8 = vld [vmem:[%s8385_s2 + $0x108] sm:$0xff]  }
 0x11a   : > { %v7212_v55 = vpack.c.bf16 %v559_v5, %v560_v17  ;;  %v7214_v48 = vpack.c.bf16 %v557_v33, %v558_v3  ;;  %v619_v37 = vsel %vm8394_vm1, %v606_v26, %v607_v60  ;;  %v620_v52 = vsel %vm8394_vm1, %v605_v12, %v606_v26  ;;  %v6718_v12 = vld [vmem:[%s8385_s2 + $0xc8] sm:$0xff]   ;;  %v6728_v26 = vld [vmem:[%s8385_s2 + $0x118] sm:$0xff]   ;;  %v6729_v17 = vld [vmem:[%s8385_s2 + $0x120] sm:$0xff]  }
 0x11b   : > { %v7220_v54 = vpack.c.bf16 %v619_v37, %v620_v52  ;;  %v7222_v57 = vpack.c.bf16 %v617_v50, %v618_v43  ;;  %v556_v23 = vsel %vm552_vm0, %v545_v18, %v546_v51  ;;  %v582_v59 = vpack.c.bf16 %v7168_v58, %v7186_v16  ;;  %5781 = vmatmul.mubr.bf16.gmra.mrb[16].mxu1 %v7178_v22  ;;  %v6723_v18 = vld [vmem:[%s8385_s2 + $0xf0] sm:$0xff]   ;;  %v6730_v33 = vld [vmem:[%s8385_s2 + $0x128] sm:$0xff]   ;;  %v6732_v50 = vld [vmem:[%s8385_s2 + $0x138] sm:$0xff]  }
 0x11c   : > { %v7232_v61 = vpack.c.bf16 %v7107_v2, %v556_v23  ;;  %v592_v60 = vpack.c.bf16 %v7006_v45, %v6995_v34  ;;  %v7250_v51 = vsel %vm8394_vm1, %v612_v27, %v593_v49  ;;  %5797 = vmatpush3.bf16.msra.mxu1 %v6707_v56  ;;  %5800 = vmatprep.mubr.bf16.mxu1 %v573_v20  ;;  %v6711_v49 = vld [vmem:[%s8385_s2 + $0x90] sm:$0xff]   ;;  %v6714_v20 = vld [vmem:[%s8385_s2 + $0xa8] sm:$0xff]   ;;  %v6725_v56 = vld [vmem:[%s8385_s2 + $0x100] sm:$0xff]  }
 0x11d   : > { %v643_v2 = vpack.c.bf16 %v7250_v51, %v7242_v38  ;;  %5798 = vmatprep.subr.bf16.mxu1 %v6708_v4  ;;  %v6715_v27 = vld [vmem:[%s8385_s2 + $0xb0] sm:$0xff]   ;;  %v6733_v43 = vld [vmem:[%s8385_s2 + $0x140] sm:$0xff]   ;;  %v6734_v5 = vld [vmem:[%s8385_s2 + $0x148] sm:$0xff]  }
 0x11e   : > { %v6731_v32 = vld [vmem:[%s8385_s2 + $0x130] sm:$0xff]   ;;  %v6736_v3 = vld [vmem:[%s8385_s2 + $0x158] sm:$0xff]   ;;  %v6738_v37 = vld [vmem:[%s8385_s2 + $0x168] sm:$0xff]  }
 0x11f   : > { %v6739_v52 = vld [vmem:[%s8385_s2 + $0x170] sm:$0xff]   ;;  %v6740_v23 = vld [vmem:[%s8385_s2 + $0x178] sm:$0xff]  }
 0x120   : > { %5799 = vmatpush3.bf16.msra.mxu1 %v6708_v4  ;;  %v6737_v4 = vld [vmem:[%s8385_s2 + $0x160] sm:$0xff]   ;;  %v6760_v58 = vld [vmem:[%s8385_s2 + $0x218] sm:$0xff]   ;;  %v6771_v34 = vld [vmem:[%s8386_s3 + $0x30] sm:$0xff]  }
 0x121   : > { %5816 = vmatprep.subr.bf16.mxu1 %v6709_v47  ;;  %v6764_v16 = vld [vmem:[%s8385_s2 + $0x238] sm:$0xff]  }
 0x122   : > { %v6772_v45 = vld [vmem:[%s8386_s3 + $0x38] sm:$0xff]  }
 0x123   : > { %5801 = vmatmul.mubr.bf16.vlgmr.msra.gmra.mrb[4].mxu1 %v7034_v7 }
 0x124   : > { %5817 = vmatpush3.bf16.msra.mxu1 %v6709_v47  ;;  %5804 = vmatprep.mubr.bf16.mxu1 %v7084_v41  ;;  %v6765_v47 = vld [vmem:[%s8386_s3] sm:$0xff]  }
 0x125   : > { %5818 = vmatprep.subr.bf16.mxu1 %v6710_v35  ;;  %6040 = vmatprep.subr.bf16.mxu0 %v6765_v47 }
 0x126   : > { %6041 = vmatpush3.bf16.msra.mxu0 %v6765_v47 }
 0x128   : > { %5819 = vmatpush3.bf16.msra.mxu1 %v6710_v35  ;;  %v6766_v35 = vld [vmem:[%s8386_s3 + $0x8] sm:$0xff]  }
 0x129   : > { %5820 = vmatprep.subr.bf16.mxu1 %v6711_v49  ;;  %6042 = vmatprep.subr.bf16.mxu0 %v6766_v35 }
 0x12a   : > { %6043 = vmatpush3.bf16.msra.mxu0 %v6766_v35 }
 0x12b   : > { %5805 = vmatmul.mubr.bf16.gmra.mrb[8].mxu1 %v7086_v42 }
 0x12c   : > { %5821 = vmatpush3.bf16.msra.mxu1 %v6711_v49  ;;  %5808 = vmatprep.mubr.bf16.mxu1 %v7148_v39  ;;  %v6741_v49 = vld [vmem:[%s8385_s2 + $0x180] sm:$0xff]  }
 0x12d   : > { %5822 = vmatprep.subr.bf16.mxu1 %v6712_v6 }
 0x130   : > { %5823 = vmatpush3.bf16.msra.mxu1 %v6712_v6  ;;  %v6767_v6 = vld [vmem:[%s8386_s3 + $0x10] sm:$0xff]  }
 0x131   : > { %5824 = vmatprep.subr.bf16.mxu1 %v6713_v15  ;;  %6044 = vmatprep.subr.bf16.mxu0 %v6767_v6 }
 0x132   : > { %6045 = vmatpush3.bf16.msra.mxu0 %v6767_v6 }
 0x133   : > { %5809 = vmatmul.mubr.bf16.gmra.mrb[12].mxu1 %v7150_v40 }
 0x134   : > { %5825 = vmatpush3.bf16.msra.mxu1 %v6713_v15  ;;  %5812 = vmatprep.mubr.bf16.mxu1 %v7212_v55  ;;  %v6742_v15 = vld [vmem:[%s8385_s2 + $0x188] sm:$0xff]  }
 0x135   : > { %5826 = vmatprep.subr.bf16.mxu1 %v6714_v20 }
 0x138   : > { %5827 = vmatpush3.bf16.msra.mxu1 %v6714_v20  ;;  %v6743_v20 = vld [vmem:[%s8385_s2 + $0x190] sm:$0xff]  }
 0x139   : > { %5828 = vmatprep.subr.bf16.mxu1 %v6715_v27 }
 0x13b   : > { %5813 = vmatmul.mubr.bf16.gmra.mrb[16].mxu1 %v7214_v48 }
 0x13c   : > { %5829 = vmatpush3.bf16.msra.mxu1 %v6715_v27  ;;  %5832 = vmatprep.mubr.bf16.mxu1 %v634_v44  ;;  %v6721_v44 = vld [vmem:[%s8385_s2 + $0xe0] sm:$0xff]  }
 0x13d   : > { %5830 = vmatprep.subr.bf16.mxu1 %v6716_v63  ;;  %v6769_v27 = vld [vmem:[%s8386_s3 + $0x20] sm:$0xff]  }
 0x140   : > { %5831 = vmatpush3.bf16.msra.mxu1 %v6716_v63  ;;  %v6744_v63 = vld [vmem:[%s8385_s2 + $0x198] sm:$0xff]  }
 0x141   : > { %5848 = vmatprep.subr.bf16.mxu1 %v6717_v1 }
 0x143   : > { %5833 = vmatmul.mubr.bf16.vlgmr.msra.gmra.mrb[4].mxu1 %v7060_v25 }
 0x144   : > { %5849 = vmatpush3.bf16.msra.mxu1 %v6717_v1  ;;  %5836 = vmatprep.mubr.bf16.mxu1 %v7099_v62  ;;  %v6770_v1 = vld [vmem:[%s8386_s3 + $0x28] sm:$0xff]  }
 0x145   : > { %5850 = vmatprep.subr.bf16.mxu1 %v6718_v12 }
 0x148   : > { %5851 = vmatpush3.bf16.msra.mxu1 %v6718_v12  ;;  %v6745_v12 = vld [vmem:[%s8385_s2 + $0x1a0] sm:$0xff]  }
 0x149   : > { %5852 = vmatprep.subr.bf16.mxu1 %v6719_v28 }
 0x14b   : > { %5837 = vmatmul.mubr.bf16.gmra.mrb[8].mxu1 %v7143_v31 }
 0x14c   : > { %5853 = vmatpush3.bf16.msra.mxu1 %v6719_v28  ;;  %5840 = vmatprep.mubr.bf16.mxu1 %v7171_v0  ;;  %v6746_v28 = vld [vmem:[%s8385_s2 + $0x1a8] sm:$0xff]  }
 0x14d   : > { %5854 = vmatprep.subr.bf16.mxu1 %v6720_v36 }
 0x150   : > { %5855 = vmatpush3.bf16.msra.mxu1 %v6720_v36  ;;  %v6747_v36 = vld [vmem:[%s8385_s2 + $0x1b0] sm:$0xff]  }
 0x151   : > { %5856 = vmatprep.subr.bf16.mxu1 %v6721_v44 }
 0x153   : > { %5841 = vmatmul.mubr.bf16.gmra.mrb[12].mxu1 %v7207_v46 }
 0x154   : > { %5857 = vmatpush3.bf16.msra.mxu1 %v6721_v44  ;;  %5844 = vmatprep.mubr.bf16.mxu1 %v7220_v54  ;;  %v6748_v44 = vld [vmem:[%s8385_s2 + $0x1b8] sm:$0xff]  }
 0x155   : > { %5858 = vmatprep.subr.bf16.mxu1 %v6722_v11 }
 0x158   : > { %5859 = vmatpush3.bf16.msra.mxu1 %v6722_v11  ;;  %v6749_v11 = vld [vmem:[%s8385_s2 + $0x1c0] sm:$0xff]  }
 0x159   : > { %5860 = vmatprep.subr.bf16.mxu1 %v6723_v18 }
 0x15b   : > { %5845 = vmatmul.mubr.bf16.gmra.mrb[16].mxu1 %v7222_v57 }
 0x15c   : > { %5861 = vmatpush3.bf16.msra.mxu1 %v6723_v18  ;;  %5864 = vmatprep.mubr.bf16.mxu1 %v7034_v7  ;;  %v6727_v7 = vld [vmem:[%s8385_s2 + $0x110] sm:$0xff]   ;;  %v6750_v18 = vld [vmem:[%s8385_s2 + $0x1c8] sm:$0xff]  }
 0x15d   : > { %5862 = vmatprep.subr.bf16.mxu1 %v6724_v21 }
 0x160   : > { %5863 = vmatpush3.bf16.msra.mxu1 %v6724_v21  ;;  %v6752_v21 = vld [vmem:[%s8385_s2 + $0x1d8] sm:$0xff]  }
 0x161   : > { %5880 = vmatprep.subr.bf16.mxu1 %v6725_v56 }
 0x163   : > { %5865 = vmatmul.mubr.bf16.vlgmr.msra.gmra.mrb[4].mxu1 %v7084_v41 }
 0x164   : > { %5881 = vmatpush3.bf16.msra.mxu1 %v6725_v56  ;;  %5868 = vmatprep.mubr.bf16.mxu1 %v7086_v42 }
 0x165   : > { %5882 = vmatprep.subr.bf16.mxu1 %v6726_v8 }
 0x168   : > { %5883 = vmatpush3.bf16.msra.mxu1 %v6726_v8 }
 0x169   : > { %5884 = vmatprep.subr.bf16.mxu1 %v6727_v7 }
 0x16b   : > { %5869 = vmatmul.mubr.bf16.gmra.mrb[8].mxu1 %v7148_v39 }
 0x16c   : > { %5885 = vmatpush3.bf16.msra.mxu1 %v6727_v7  ;;  %5872 = vmatprep.mubr.bf16.mxu1 %v7150_v40 }
 0x16d   : > { %5886 = vmatprep.subr.bf16.mxu1 %v6728_v26 }
 0x170   : > { %5887 = vmatpush3.bf16.msra.mxu1 %v6728_v26  ;;  %v6775_v26 = vld [vmem:[%s8387_s4 + $0x50] sm:$0xff]  }
 0x171   : > { %5888 = vmatprep.subr.bf16.mxu1 %v6729_v17 }
 0x173   : > { %5873 = vmatmul.mubr.bf16.gmra.mrb[12].mxu1 %v7212_v55 }
 0x174   : > { %5889 = vmatpush3.bf16.msra.mxu1 %v6729_v17  ;;  %5876 = vmatprep.mubr.bf16.mxu1 %v7214_v48 }
 0x175   : > { %5890 = vmatprep.subr.bf16.mxu1 %v6730_v33 }
 0x178   : > { %5891 = vmatpush3.bf16.msra.mxu1 %v6730_v33 }
 0x179   : > { %5892 = vmatprep.subr.bf16.mxu1 %v6731_v32 }
 0x17b   : > { %5877 = vmatmul.mubr.bf16.gmra.mrb[16].mxu1 %v7232_v61 }
 0x17c   : > { %5893 = vmatpush3.bf16.msra.mxu1 %v6731_v32  ;;  %5896 = vmatprep.mubr.bf16.mxu1 %v7015_v53  ;;  %v6735_v53 = vld [vmem:[%s8385_s2 + $0x150] sm:$0xff]  }
 0x17d   : > { %5894 = vmatprep.subr.bf16.mxu1 %v6732_v50 }
 0x180   : > { %5895 = vmatpush3.bf16.msra.mxu1 %v6732_v50 }
 0x181   : > { %5912 = vmatprep.subr.bf16.mxu1 %v6733_v43 }
 0x183   : > { %5897 = vmatmul.mubr.bf16.vlgmr.msra.gmra.mrb[4].mxu1 %v7058_v24 }
 0x184   : > { %5913 = vmatpush3.bf16.msra.mxu1 %v6733_v43  ;;  %5900 = vmatprep.mubr.bf16.mxu1 %v7052_v19  ;;  %v6776_v43 = vld [vmem:[%s8387_s4 + $0x58] sm:$0xff]  }
 0x185   : > { %5914 = vmatprep.subr.bf16.mxu1 %v6734_v5 }
 0x188   : > { %5915 = vmatpush3.bf16.msra.mxu1 %v6734_v5 }
 0x189   : > { %5916 = vmatprep.subr.bf16.mxu1 %v6735_v53 }
 0x18b   : > { %5901 = vmatmul.mubr.bf16.gmra.mrb[8].mxu1 %v7121_v14 }
 0x18c   : > { %5917 = vmatpush3.bf16.msra.mxu1 %v6735_v53  ;;  %5904 = vmatprep.mubr.bf16.mxu1 %v7115_v9 }
 0x18d   : > { %5918 = vmatprep.subr.bf16.mxu1 %v6736_v3 }
 0x190   : > { %5919 = vmatpush3.bf16.msra.mxu1 %v6736_v3 }
 0x191   : > { %5920 = vmatprep.subr.bf16.mxu1 %v6737_v4 }
 0x193   : > { %5905 = vmatmul.mubr.bf16.gmra.mrb[12].mxu1 %v7188_v29 }
 0x194   : > { %5921 = vmatpush3.bf16.msra.mxu1 %v6737_v4  ;;  %5908 = vmatprep.mubr.bf16.mxu1 %v7178_v22 }
 0x195   : > { %5922 = vmatprep.subr.bf16.mxu1 %v6738_v37 }
 0x198   : > { %5923 = vmatpush3.bf16.msra.mxu1 %v6738_v37 }
 0x199   : > { %5924 = vmatprep.subr.bf16.mxu1 %v6739_v52 }
 0x19b   : > { %5909 = vmatmul.mubr.bf16.gmra.mrb[16].mxu1 %v7119_v10 }
 0x19c   : > { %5925 = vmatpush3.bf16.msra.mxu1 %v6739_v52  ;;  %5928 = vmatprep.mubr.bf16.mxu1 %v7060_v25  ;;  %v6768_v25 = vld [vmem:[%s8386_s3 + $0x18] sm:$0xff]  }
 0x19d   : > { %5926 = vmatprep.subr.bf16.mxu1 %v6740_v23  ;;  %6046 = vmatprep.subr.bf16.mxu0 %v6768_v25 }
 0x19e   : > { %6047 = vmatpush3.bf16.msra.mxu0 %v6768_v25 }
 0x19f   : > { %6048 = vmatprep.subr.bf16.mxu0 %v6769_v27 }
 0x1a0   : > { %5927 = vmatpush3.bf16.msra.mxu1 %v6740_v23  ;;  %v6777_v23 = vld [vmem:[%s8387_s4 + $0x60] sm:$0xff]  }
 0x1a1   : > { %5944 = vmatprep.subr.bf16.mxu1 %v6741_v49 }
 0x1a2   : > { %6049 = vmatpush3.bf16.msra.mxu0 %v6769_v27 }
 0x1a3   : > { %5929 = vmatmul.mubr.bf16.vlgmr.msra.gmra.mrb[4].mxu1 %v7099_v62  ;;  %6050 = vmatprep.subr.bf16.mxu0 %v6770_v1 }
 0x1a4   : > { %5945 = vmatpush3.bf16.msra.mxu1 %v6741_v49  ;;  %5932 = vmatprep.mubr.bf16.mxu1 %v7143_v31 }
 0x1a5   : > { %5946 = vmatprep.subr.bf16.mxu1 %v6742_v15 }
 0x1a6   : > { %6051 = vmatpush3.bf16.msra.mxu0 %v6770_v1 }
 0x1a7   : > { %6052 = vmatprep.subr.bf16.mxu0 %v6771_v34 }
 0x1a8   : > { %5947 = vmatpush3.bf16.msra.mxu1 %v6742_v15  ;;  %v6778_v15 = vld [vmem:[%s8387_s4 + $0x68] sm:$0xff]  }
 0x1a9   : > { %5948 = vmatprep.subr.bf16.mxu1 %v6743_v20 }
 0x1aa   : > { %6053 = vmatpush3.bf16.msra.mxu0 %v6771_v34  ;;  %v6862_v34 = vld [vmem:[%s6937_s8 + $0x10] sm:$0xff]  }
 0x1ab   : > { %5933 = vmatmul.mubr.bf16.gmra.mrb[8].mxu1 %v7171_v0  ;;  %6054 = vmatprep.subr.bf16.mxu0 %v6772_v45 }
 0x1ac   : > { %5949 = vmatpush3.bf16.msra.mxu1 %v6743_v20  ;;  %5936 = vmatprep.mubr.bf16.mxu1 %v7207_v46 }
 0x1ad   : > { %5950 = vmatprep.subr.bf16.mxu1 %v6744_v63 }
 0x1ae   : > { %6055 = vmatpush3.bf16.msra.mxu0 %v6772_v45  ;;  %v2255_v45 = vunpack.c.l.bf16 %v6862_v34 }
 0x1b0   : > { %5951 = vmatpush3.bf16.msra.mxu1 %v6744_v63 }
 0x1b1   : > { %5952 = vmatprep.subr.bf16.mxu1 %v6745_v12 }
 0x1b3   : > { %5937 = vmatmul.mubr.bf16.gmra.mrb[12].mxu1 %v7220_v54 }
 0x1b4   : > { %5953 = vmatpush3.bf16.msra.mxu1 %v6745_v12  ;;  %5940 = vmatprep.mubr.bf16.mxu1 %v7222_v57 }
 0x1b5   : > { %5954 = vmatprep.subr.bf16.mxu1 %v6746_v28 }
 0x1b8   : > { %5955 = vmatpush3.bf16.msra.mxu1 %v6746_v28 }
 0x1b9   : > { %5956 = vmatprep.subr.bf16.mxu1 %v6747_v36 }
 0x1bb   : > { %5941 = vmatmul.mubr.bf16.gmra.mrb[16].mxu1 %v7173_v13 }
 0x1bc   : > { %5957 = vmatpush3.bf16.msra.mxu1 %v6747_v36  ;;  %5960 = vmatprep.mubr.bf16.mxu1 %v7084_v41  ;;  %v6751_v41 = vld [vmem:[%s8385_s2 + $0x1d0] sm:$0xff]  }
 0x1bd   : > { %5958 = vmatprep.subr.bf16.mxu1 %v6748_v44 }
 0x1c0   : > { %5959 = vmatpush3.bf16.msra.mxu1 %v6748_v44 }
 0x1c1   : > { %5976 = vmatprep.subr.bf16.mxu1 %v6749_v11 }
 0x1c3   : > { %5961 = vmatmul.mubr.bf16.vlgmr.msra.gmra.mrb[4].mxu1 %v7086_v42  ;;  %v6753_v42 = vld [vmem:[%s8385_s2 + $0x1e0] sm:$0xff]  }
 0x1c4   : > { %5977 = vmatpush3.bf16.msra.mxu1 %v6749_v11  ;;  %5964 = vmatprep.mubr.bf16.mxu1 %v7148_v39  ;;  %v6754_v39 = vld [vmem:[%s8385_s2 + $0x1e8] sm:$0xff]  }
 0x1c5   : > { %5978 = vmatprep.subr.bf16.mxu1 %v6750_v18 }
 0x1c8   : > { %5979 = vmatpush3.bf16.msra.mxu1 %v6750_v18  ;;  %v6779_v18 = vld [vmem:[%s8387_s4 + $0x70] sm:$0xff]  }
 0x1c9   : > { %5980 = vmatprep.subr.bf16.mxu1 %v6751_v41 }
 0x1cb   : > { %5965 = vmatmul.mubr.bf16.gmra.mrb[8].mxu1 %v7150_v40  ;;  %v6755_v40 = vld [vmem:[%s8385_s2 + $0x1f0] sm:$0xff]  }
 0x1cc   : > { %5981 = vmatpush3.bf16.msra.mxu1 %v6751_v41  ;;  %5968 = vmatprep.mubr.bf16.mxu1 %v7212_v55  ;;  %v6756_v55 = vld [vmem:[%s8385_s2 + $0x1f8] sm:$0xff]  }
 0x1cd   : > { %5982 = vmatprep.subr.bf16.mxu1 %v6752_v21  ;;  %v6780_v41 = vld [vmem:[%s8387_s4 + $0x78] sm:$0xff]  }
 0x1d0   : > { %5983 = vmatpush3.bf16.msra.mxu1 %v6752_v21  ;;  %v7547_v21 = vld [vmem:[%s8387_s4] sm:$0xff]  }
 0x1d1   : > { %5984 = vmatprep.subr.bf16.mxu1 %v6753_v42 }
 0x1d3   : > { %5969 = vmatmul.mubr.bf16.gmra.mrb[12].mxu1 %v7214_v48  ;;  %v6757_v48 = vld [vmem:[%s8385_s2 + $0x200] sm:$0xff]  }
 0x1d4   : > { %5985 = vmatpush3.bf16.msra.mxu1 %v6753_v42  ;;  %5972 = vmatprep.mubr.bf16.mxu1 %v7232_v61  ;;  %v6758_v61 = vld [vmem:[%s8385_s2 + $0x208] sm:$0xff]   ;;  %v8390_v42 = vmov 0.0|0.0  }
 0x1d5   : > { %5986 = vmatprep.subr.bf16.mxu1 %v6754_v39 }
 0x1d8   : > { %5987 = vmatpush3.bf16.msra.mxu1 %v6754_v39  ;;  %v2431_v39 = vadd.s32 16, %v6991_v30 }
 0x1d9   : > { %5988 = vmatprep.subr.bf16.mxu1 %v6755_v40 }
 0x1db   : > { %5973 = vmatmul.mubr.bf16.gmra.mrb[16].mxu1 %v582_v59 }
 0x1dc   : > { %5989 = vmatpush3.bf16.msra.mxu1 %v6755_v40  ;;  %5992 = vmatprep.mubr.bf16.mxu1 %v7058_v24  ;;  %v6759_v24 = vld [vmem:[%s8385_s2 + $0x210] sm:$0xff]   ;;  %v2432_v40 = vadd.s32 24, %v6991_v30 }
 0x1dd   : > { %5990 = vmatprep.subr.bf16.mxu1 %v6756_v55 }
 0x1e0   : > { %5991 = vmatpush3.bf16.msra.mxu1 %v6756_v55  ;;  %v2430_v55 = vadd.s32 8, %v6991_v30 }
 0x1e1   : > { %6008 = vmatprep.subr.bf16.mxu1 %v6757_v48 }
 0x1e3   : > { %5993 = vmatmul.mubr.bf16.vlgmr.msra.gmra.mrb[4].mxu1 %v7052_v19  ;;  %v6761_v19 = vld [vmem:[%s8385_s2 + $0x220] sm:$0xff]  }
 0x1e4   : > { %6009 = vmatpush3.bf16.msra.mxu1 %v6757_v48  ;;  %5996 = vmatprep.mubr.bf16.mxu1 %v7121_v14  ;;  %v6762_v14 = vld [vmem:[%s8385_s2 + $0x228] sm:$0xff]   ;;  %v2463_v48 = vand.u32 15, %v2431_v39 }
 0x1e5   : > { %6010 = vmatprep.subr.bf16.mxu1 %v6758_v61 }
 0x1e6   : > { %vm7562_vm2 = vcmp.ge.s32.totalorder %v2463_v48, 1 }
 0x1e8   : > { %6011 = vmatpush3.bf16.msra.mxu1 %v6758_v61  ;;  %v2449_v61 = vand.u32 15, %v6991_v30 }
 0x1e9   : > { %6012 = vmatprep.subr.bf16.mxu1 %v6759_v24 }
 0x1ea   : > { %vm7567_vm3 = vcmp.ge.s32.totalorder %v2449_v61, 1 }
 0x1eb   : > { %5997 = vmatmul.mubr.bf16.gmra.mrb[8].mxu1 %v7115_v9  ;;  %v6763_v9 = vld [vmem:[%s8385_s2 + $0x230] sm:$0xff]  }
 0x1ec   : > { %6013 = vmatpush3.bf16.msra.mxu1 %v6759_v24  ;;  %6000 = vmatprep.mubr.bf16.mxu1 %v7188_v29  ;;  %v7556_v24 = vld [vmem:[%s6937_s8 + $0x40] sm:$0xff]  }
 0x1ed   : > { %6014 = vmatprep.subr.bf16.mxu1 %v6760_v58 }
 0x1f0   : > { %6015 = vmatpush3.bf16.msra.mxu1 %v6760_v58  ;;  %v2267_v58 = vunpack.c.l.bf16 %v7556_v24 }
 0x1f1   : > { %6016 = vmatprep.subr.bf16.mxu1 %v6761_v19 }
 0x1f3   : > { %6001 = vmatmul.mubr.bf16.gmra.mrb[12].mxu1 %v7178_v22 }
 0x1f4   : > { %6017 = vmatpush3.bf16.msra.mxu1 %v6761_v19  ;;  %6004 = vmatprep.mubr.bf16.mxu1 %v7119_v10  ;;  %v2470_v19 = vand.u32 15, %v2432_v40 }
 0x1f5   : > { %6018 = vmatprep.subr.bf16.mxu1 %v6762_v14 }
 0x1f6   : > { %vm7580_vm4 = vcmp.le.s32.totalorder %v2470_v19, 8  ;;  %v7640_v19 = vld [vmem:[%s6937_s8 + $0x38] sm:$0xff]  }
 0x1f7   : > { %vm7683_vm11 = vmpackc.low %vm7580_vm4, %vm7562_vm2 }
 0x1f8   : > { %6019 = vmatpush3.bf16.msra.mxu1 %v6762_v14  ;;  %v2456_v14 = vand.u32 15, %v2430_v55 }
 0x1f9   : > { %6020 = vmatprep.subr.bf16.mxu1 %v6763_v9 }
 0x1fa   : > { %vm7584_vm5 = vcmp.le.s32.totalorder %v2456_v14, 8  ;;  %v2265_v14 = vunpack.c.l.bf16 %v7640_v19 }
 0x1fb   : > { %6005 = vmatmul.mubr.bf16.gmra.mrb[16].mxu1 %v592_v60  ;;  %v6774_v60 = vld [vmem:[%s8387_s4 + $0x48] sm:$0xff]   ;;  %vm8393_vm10 = vmpackc.low %vm7584_vm5, %vm7567_vm3 }
 0x1fc   : > { %6021 = vmatpush3.bf16.msra.mxu1 %v6763_v9  ;;  %6024 = vmatprep.mubr.bf16.mxu1 %v7099_v62  ;;  %v6773_v62 = vld [vmem:[%s8387_s4 + $0x40] sm:$0xff]   ;;  %v2435_v9 = vadd.s32 48, %v6991_v30 }
 0x1fd   : > { %6022 = vmatprep.subr.bf16.mxu1 %v6764_v16  ;;  %6072 = vmatprep.subr.bf16.mxu0 %v6773_v62 }
 0x200   : > { %6023 = vmatpush3.bf16.msra.mxu1 %v6764_v16  ;;  %v2268_v16 = vunpack.c.h.bf16 %v7556_v24 }
 0x203   : > { %6025 = vmatmul.mubr.bf16.vlgmr.msra.gmra.mrb[4].mxu1 %v7143_v31 }
 0x204   : > { %6028 = vmatprep.mubr.bf16.mxu1 %v7171_v0 }
 0x20b   : > { %6029 = vmatmul.mubr.bf16.gmra.mrb[8].mxu1 %v7207_v46 }
 0x20c   : > { %6032 = vmatprep.mubr.bf16.mxu1 %v7220_v54 }
 0x213   : > { %6033 = vmatmul.mubr.bf16.gmra.mrb[12].mxu1 %v7222_v57 }
 0x214   : > { %6036 = vmatprep.mubr.bf16.mxu1 %v7173_v13 }
 0x21b   : > { %6037 = vmatmul.mubr.bf16.gmra.mrb[16].mxu1 %v643_v2 }
 0x2d6   : > { %v6026_v10 = vpop.f32.mrb[4].mxu1 }
 0x2d7   : > { %v2134_v31 = vpop.f32.mrb[5].mxu1  ;;  %v2215_v13 = vmax.f32 %v6026_v10, 0.0  ;;  %v6863_v10 = vld [vmem:[%s6937_s8 + $0x8] sm:$0xff]  }
 0x2d8   : > { %v6027_v0 = vpop.f32.mrb[6].mxu1  ;;  %v2213_v46 = vmax.f32 %v2134_v31, 0.0  ;;  %v2253_v31 = vunpack.c.l.bf16 %v6863_v10 }
 0x2d9   : > { %v2216_v22 = vmax.f32 %v6027_v0, 0.0  ;;  %v2137_v29 = vpop.f32.mrb[7].mxu1  ;;  %v6815_v0 = vld [vmem:[%s8387_s4 + $0x150] sm:$0xff]  }
 0x2da   : > { %v2214_v54 = vmax.f32 %v2137_v29, 0.0  ;;  %v2433_v29 = vadd.s32 32, %v6991_v30 }
 0x2db   : > { %v2230_v57 = vpack.c.bf16 %v2216_v22, %v2215_v13  ;;  %v8392_v13 = vmov 0.0  }
 0x2dc   : > { %v2229_v59 = vpack.c.bf16 %v2214_v54, %v2213_v46  ;;  %v7572_v22 = vrot.slane %v8392_v13, 7  ;;  %v2436_v46 = vadd.s32 56, %v6991_v30  ;;  %v2256_v54 = vunpack.c.h.bf16 %v6862_v34 }
 0x2de   : > { %v6030_v38 = vpop.f32.mrb[8].mxu1  ;;  %6056 = vmatprep.mubr.bf16.mxu0 %v2229_v59  ;;  %v2434_v59 = vadd.s32 40, %v6991_v30 }
 0x2df   : > { %v2150_v51 = vpop.f32.mrb[9].mxu1  ;;  %6057 = vmatmul.mubr.bf16.vlgmr.msra.gmra.mrb[16].mxu0 %v2230_v57  ;;  %v2219_v56 = vmax.f32 %v6030_v38, 0.0  ;;  %v2254_v57 = vunpack.c.h.bf16 %v6863_v10 }
 0x2e0   : > { %v6031_v2 = vpop.f32.mrb[10].mxu1  ;;  %6073 = vmatpush3.bf16.msra.mxu0 %v6773_v62  ;;  %v2217_v17 = vmax.f32 %v2150_v51, 0.0  ;;  %v6816_v51 = vld [vmem:[%s8387_s4 + $0x158] sm:$0xff]  }
 0x2e1   : > { %v2220_v8 = vmax.f32 %v6031_v2, 0.0  ;;  %v2153_v7 = vpop.f32.mrb[11].mxu1  ;;  %6074 = vmatprep.subr.bf16.mxu0 %v6774_v60  ;;  %v7589_v2 = vld [vmem:[%s6937_s8 + $0x20] sm:$0xff]  }
 0x2e2   : > { %v2218_v33 = vmax.f32 %v2153_v7, 0.0  ;;  %v7593_v7 = vld [vmem:[%s6937_s8 + $0x18] sm:$0xff]  }
 0x2e3   : > { %v2232_v32 = vpack.c.bf16 %v2220_v8, %v2219_v56  ;;  %v2259_v56 = vunpack.c.l.bf16 %v7589_v2  ;;  %v2491_v8 = vand.u32 15, %v2435_v9 }
 0x2e4   : > { %v2231_v50 = vpack.c.bf16 %v2218_v33, %v2217_v17  ;;  %6075 = vmatpush3.bf16.msra.mxu0 %v6774_v60  ;;  %v7578_v60 = vadd.s32 80, %v6991_v30  ;;  %v2260_v17 = vunpack.c.h.bf16 %v7589_v2  ;;  %v7598_v33 = vadd.s32 64, %v6991_v30 }
 0x2e5   : > { %6076 = vmatprep.subr.bf16.mxu0 %v6775_v26  ;;  %vm7625_vm6 = vcmp.ge.s32.totalorder %v2491_v8, 1  ;;  %v2266_v2 = vunpack.c.h.bf16 %v7640_v19 }
 0x2e6   : > { %v6034_v5 = vpop.f32.mrb[12].mxu1  ;;  %6060 = vmatprep.mubr.bf16.mxu0 %v2231_v50  ;;  %v2477_v50 = vand.u32 15, %v2433_v29 }
 0x2e7   : > { %v2166_v53 = vpop.f32.mrb[13].mxu1  ;;  %6061 = vmatmul.mubr.bf16.gmra.mrb[20].mxu0 %v2232_v32  ;;  %v2223_v4 = vmax.f32 %v6034_v5, 0.0  ;;  %v7601_v32 = vadd.s32 88, %v6991_v30  ;;  %v2258_v5 = vunpack.c.h.bf16 %v7593_v7 }
 0x2e8   : > { %v6035_v3 = vpop.f32.mrb[14].mxu1  ;;  %6077 = vmatpush3.bf16.msra.mxu0 %v6775_v26  ;;  %v2221_v47 = vmax.f32 %v2166_v53, 0.0  ;;  %v2257_v26 = vunpack.c.l.bf16 %v7593_v7  ;;  %v7605_v53 = vadd.s32 72, %v6991_v30  ;;  %vm7632_vm7 = vcmp.ge.s32.totalorder %v2477_v50, 1 }
 0x2e9   : > { %v2224_v37 = vmax.f32 %v6035_v3, 0.0  ;;  %v2169_v52 = vpop.f32.mrb[15].mxu1  ;;  %6078 = vmatprep.subr.bf16.mxu0 %v6776_v43 }
 0x2ea   : > { %v2222_v35 = vmax.f32 %v2169_v52, 0.0  ;;  %v2512_v40 = vand.u32 15, %v7605_v53 }
 0x2eb   : > { %v2234_v49 = vpack.c.bf16 %v2224_v37, %v2223_v4  ;;  %v2484_v4 = vand.u32 15, %v2434_v59  ;;  %v7608_v37 = vld [vmem:[%s6937_s8 + $0x30] sm:$0xff]   ;;  %v7660_v59 = vadd.s32 104, %v6991_v30 }
 0x2ec   : > { %v2233_v6 = vpack.c.bf16 %v2222_v35, %v2221_v47  ;;  %6079 = vmatpush3.bf16.msra.mxu0 %v6776_v43  ;;  %v2498_v43 = vand.u32 15, %v2436_v46  ;;  %v2263_v52 = vunpack.c.l.bf16 %v7608_v37  ;;  %v7613_v47 = vadd.s32 112, %v6991_v30 }
 0x2ed   : > { %6080 = vmatprep.subr.bf16.mxu0 %v6777_v23  ;;  %vm7649_vm9 = vcmp.le.s32.totalorder %v2484_v4, 8  ;;  %vm7755_vm15 = vcmp.le.s32.totalorder %v2512_v40, 8  ;;  %v2540_v7 = vand.u32 15, %v7660_v59 }
 0x2ee   : > { %v6038_v25 = vpop.f32.mrb[16].mxu1  ;;  %6064 = vmatprep.mubr.bf16.mxu0 %v2233_v6  ;;  %v7616_v6 = vld [vmem:[%s6937_s8 + $0x28] sm:$0xff]   ;;  %v2547_v61 = vand.u32 15, %v7613_v47  ;;  %vm7645_vm8 = vcmp.le.s32.totalorder %v2498_v43, 8 }
 0x2ef   : > { %v2182_v20 = vpop.f32.mrb[17].mxu1  ;;  %6065 = vmatmul.mubr.bf16.gmra.mrb[24].mxu0 %v2234_v49  ;;  %v2227_v63 = vmax.f32 %v6038_v25, 0.0  ;;  %v7620_v25 = vadd.s32 96, %v6991_v30  ;;  %v2262_v39 = vunpack.c.h.bf16 %v7616_v6 }
 0x2f0   : > { %v6039_v27 = vpop.f32.mrb[18].mxu1  ;;  %6081 = vmatpush3.bf16.msra.mxu0 %v6777_v23  ;;  %v2225_v28 = vmax.f32 %v2182_v20, 0.0  ;;  %v2519_v23 = vand.u32 15, %v7578_v60  ;;  %v7623_v20 = vadd.s32 120, %v6991_v30  ;;  %v6783_v60 = vld [vmem:[%s8387_s4 + $0x10] sm:$0xff]  }
 0x2f1   : > { %v2228_v1 = vmax.f32 %v6039_v27, 0.0  ;;  %v2185_v12 = vpop.f32.mrb[19].mxu1  ;;  %6082 = vmatprep.subr.bf16.mxu0 %v6778_v15 }
 0x2f2   : > { %v2226_v36 = vmax.f32 %v2185_v12, 0.0  ;;  %v2505_v12 = vand.u32 15, %v7598_v33  ;;  %v2554_v29 = vand.u32 15, %v7623_v20  ;;  %vm7728_vm12 = vcmp.ge.s32.totalorder %v2519_v23, 1 }
 0x2f3   : > { %v2236_v44 = vpack.c.bf16 %v2228_v1, %v2227_v63 }
 0x2f4   : > { %v2235_v11 = vpack.c.bf16 %v2226_v36, %v2225_v28  ;;  %6083 = vmatpush3.bf16.msra.mxu0 %v6778_v15  ;;  %v2261_v15 = vunpack.c.l.bf16 %v7616_v6  ;;  %v2264_v28 = vunpack.c.h.bf16 %v7608_v37  ;;  %v2526_v36 = vand.u32 15, %v7601_v32 }
 0x2f5   : > { %6084 = vmatprep.subr.bf16.mxu0 %v6779_v18  ;;  %vm7732_vm13 = vcmp.ge.s32.totalorder %v2505_v12, 1 }
 0x2f6   : > { %6068 = vmatprep.mubr.bf16.mxu0 %v2235_v11  ;;  %vm7751_vm14 = vcmp.le.s32.totalorder %v2526_v36, 8 }
 0x2f7   : > { %6069 = vmatmul.mubr.bf16.gmra.mrb[28].mxu0 %v2236_v44 }
 0x2f8   : > { %6085 = vmatpush3.bf16.msra.mxu0 %v6779_v18  ;;  %6088 = vmatprep.mubr.bf16.mxu0 %v8390_v42  ;;  %v6784_v42 = vld [vmem:[%s8387_s4 + $0x18] sm:$0xff]  }
 0x2f9   : > { %6086 = vmatprep.subr.bf16.mxu0 %v6780_v41 }
 0x2fc   : > { %6087 = vmatpush3.bf16.msra.mxu0 %v6780_v41  ;;  %v6844_v41 = vld [vmem:[%s8387_s4 + $0x238] sm:$0xff]  }
 0x2fd   : > { %6104 = vmatprep.subr.bf16.mxu0 %v7547_v21 }
 0x3b2   : > { %v6058_v3 = vpop.f32.mrb[16].mxu0 }
 0x3b3   : > { %v2360_v35 = vadd.f32 %v6058_v3, %v2255_v45  ;;  %v2351_v49 = vpop.f32.mrb[17].mxu0 }
 0x3b4   : > { %v2352_v27 = vadd.f32 %v2351_v49, %v2253_v31  ;;  %v6059_v63 = vpop.f32.mrb[18].mxu0  ;;  %v2533_v31 = vand.u32 15, %v7620_v25  ;;  %v6840_v49 = vld [vmem:[%s8387_s4 + $0x218] sm:$0xff]  }
 0x3b5   : > { %v2416_v44 = vmax.f32 %v2360_v35, 0.0  ;;  %v2363_v11 = vadd.f32 %v6059_v63, %v2256_v54  ;;  %v2354_v18 = vpop.f32.mrb[19].mxu0 }
 0x3b6   : > { %v2414_v55 = vmax.f32 %v2352_v27, 0.0  ;;  %v2355_v48 = vadd.f32 %v2354_v18, %v2254_v57  ;;  %v6782_v27 = vld [vmem:[%s8387_s4 + $0x8] sm:$0xff]  }
 0x3b7   : > { %v2719_v9 = vsel %vm7562_vm2, %v2416_v44, 0.0  ;;  %v2417_v34 = vmax.f32 %v2363_v11, 0.0  ;;  %vm7785_vm2 = vmpackc.low %vm7649_vm9, %vm7632_vm7 }
 0x3b8   : > { %v2777_v46 = vrot.slane %v2719_v9, 7  ;;  %v7657_v54 = vsel %vm7567_vm3, %v2414_v55, 0.0  ;;  %v2415_v57 = vmax.f32 %v2355_v48, 0.0  ;;  %v2837_v8 = vrot.slane %v2719_v9, 1 }
 0x3b9   : > { %v2775_v33 = vrot.slane %v7657_v54, 7  ;;  %v7665_v32 = vsel %vm7580_vm4, %v2417_v34, 0.0  ;;  %v7667_v50 = vpack.c.bf16 %v2417_v34, %v2416_v44  ;;  %v8391_v63 = vrot.slane %v7657_v54, 1  ;;  %vm7801_vm4 = vmpackc.low %vm7645_vm8, %vm7625_vm6 }
 0x3ba   : > { %v2778_v43 = vrot.slane %v7665_v32, 7  ;;  %v2838_v53 = vrot.slane %v7665_v32, 1  ;;  %v2718_v3 = vsel %vm7584_vm5, %v2415_v57, 0.0  ;;  %v7677_v4 = vpack.c.bf16 %v2415_v57, %v2414_v55  ;;  %v6062_v35 = vpop.f32.mrb[20].mxu0  ;;  %v6785_v32 = vld [vmem:[%s8387_s4 + $0x20] sm:$0xff]  }
 0x3bb   : > { %v2776_v44 = vrot.slane %v2718_v3, 7  ;;  %v2836_v11 = vrot.slane %v2718_v3, 1  ;;  %v2376_v18 = vadd.f32 %v6062_v35, %v2259_v56  ;;  %v2367_v55 = vpop.f32.mrb[21].mxu0  ;;  %v2810_v62 = vsel %vm552_vm0, %v7572_v22, %v2775_v33 }
 0x3bc   : > { %v2368_v38 = vadd.f32 %v2367_v55, %v2257_v26  ;;  %v6063_v48 = vpop.f32.mrb[22].mxu0  ;;  %6089 = vmatmul.mubr.msk.bf16.vlgmr.msra.gmra.mrb[32].mxu0 %vm8393_vm10, %v7677_v4  ;;  %v2807_v56 = vsel %vm552_vm0, %v2777_v46, %v2778_v43  ;;  %v7712_v9 = vsel %vm8394_vm1, %v2837_v8, %v2838_v53  ;;  %vm7898_vm10 = vmpackc.low %vm7755_vm15, %vm7732_vm13 }
 0x3bd   : > { %v2809_v26 = vsel %vm552_vm0, %v2775_v33, %v2776_v44  ;;  %v2868_v34 = vsel %vm8394_vm1, %v2836_v11, %v2837_v8  ;;  %v2869_v57 = vsel %vm8394_vm1, %v8391_v63, %v2836_v11  ;;  %v2420_v3 = vmax.f32 %v2376_v18, 0.0  ;;  %6105 = vmatpush3.bf16.msra.mxu0 %v7547_v21  ;;  %v2370_v35 = vpop.f32.mrb[23].mxu0  ;;  %6092 = vmatprep.mubr.msk.bf16.mxu0 %vm7683_vm11, %v7667_v50  ;;  %v6786_v8 = vld [vmem:[%s8387_s4 + $0x28] sm:$0xff]  }
 0x3be   : > { %v7736_v55 = vpack.c.bf16 %v2809_v26, %v2810_v62  ;;  %v7738_v11 = vpack.c.bf16 %v2868_v34, %v2869_v57  ;;  %v2418_v21 = vmax.f32 %v2368_v38, 0.0  ;;  %v2379_v18 = vadd.f32 %v6063_v48, %v2260_v17  ;;  %6106 = vmatprep.subr.bf16.mxu0 %v6782_v27 }
 0x3bf   : > { %v7747_v23 = vsel %vm7625_vm6, %v2420_v3, 0.0  ;;  %v2371_v12 = vadd.f32 %v2370_v35, %v2258_v5  ;;  %v2808_v17 = vsel %vm552_vm0, %v2776_v44, %v2777_v46  ;;  %vm7821_vm6 = vcmp.ge.s32.totalorder %v2547_v61, 1 }
 0x3c0   : > { %v7764_v48 = vsel %vm7632_vm7, %v2418_v21, 0.0  ;;  %v2421_v26 = vmax.f32 %v2379_v18, 0.0  ;;  %v7771_v57 = vpack.c.bf16 %v2807_v56, %v2808_v17  ;;  %v2781_v46 = vrot.slane %v7747_v23, 7 }
 0x3c1   : > { %v2779_v36 = vrot.slane %v7764_v48, 7  ;;  %v2839_v40 = vrot.slane %v7764_v48, 1  ;;  %v2419_v34 = vmax.f32 %v2371_v12, 0.0  ;;  %6107 = vmatpush3.bf16.msra.mxu0 %v6782_v27  ;;  %v2841_v44 = vrot.slane %v7747_v23, 1  ;;  %v6842_v27 = vld [vmem:[%s8387_s4 + $0x228] sm:$0xff]  }
 0x3c2   : > { %v7777_v35 = vsel %vm7645_vm8, %v2421_v26, 0.0  ;;  %v7779_v59 = vpack.c.bf16 %v2421_v26, %v2420_v3  ;;  %v6066_v18 = vpop.f32.mrb[24].mxu0  ;;  %6108 = vmatprep.subr.bf16.mxu0 %v6783_v60  ;;  %vm7827_vm7 = vcmp.ge.s32.totalorder %v2533_v31, 1  ;;  %vm7855_vm8 = vcmp.le.s32.totalorder %v2554_v29, 8 }
 0x3c3   : > { %v2782_v56 = vrot.slane %v7777_v35, 7  ;;  %v2842_v12 = vrot.slane %v7777_v35, 1  ;;  %v7793_v17 = vsel %vm7649_vm9, %v2419_v34, 0.0  ;;  %v7795_v3 = vpack.c.bf16 %v2419_v34, %v2418_v21  ;;  %v2383_v26 = vpop.f32.mrb[25].mxu0 }
 0x3c4   : > { %v2780_v63 = vrot.slane %v7793_v17, 7  ;;  %v2840_v10 = vrot.slane %v7793_v17, 1  ;;  %v2392_v21 = vadd.f32 %v6066_v18, %v2263_v52  ;;  %v2384_v1 = vadd.f32 %v2383_v26, %v2261_v15  ;;  %v6067_v34 = vpop.f32.mrb[26].mxu0 }
 0x3c5   : > { %v2395_v45 = vadd.f32 %v6067_v34, %v2264_v28  ;;  %6093 = vmatmul.mubr.msk.bf16.gmra.mrb[36].mxu0 %vm7785_vm2, %v7795_v3  ;;  %v2386_v13 = vpop.f32.mrb[27].mxu0  ;;  %v2806_v37 = vsel %vm552_vm0, %v2778_v43, %v2779_v36  ;;  %v2803_v15 = vsel %vm552_vm0, %v2781_v46, %v2782_v56  ;;  %v2866_v47 = vsel %vm8394_vm1, %v2838_v53, %v2839_v40  ;;  %vm7908_vm1 = vmpackc.low %vm7751_vm14, %vm7728_vm12  ;;  %v6851_v53 = vld [vmem:[%s8388_s5 + $0x30] sm:$0xff]  }
 0x3c6   : > { %v2424_v25 = vmax.f32 %v2392_v21, 0.0  ;;  %v2422_v28 = vmax.f32 %v2384_v1, 0.0  ;;  %6109 = vmatpush3.bf16.msra.mxu0 %v6783_v60  ;;  %v2387_v61 = vadd.f32 %v2386_v13, %v2262_v39  ;;  %6096 = vmatprep.mubr.msk.bf16.mxu0 %vm7801_vm4, %v7779_v59  ;;  %v2805_v31 = vsel %vm552_vm0, %v2779_v36, %v2780_v63 }
 0x3c7   : > { %v2425_v43 = vmax.f32 %v2395_v45, 0.0  ;;  %6110 = vmatprep.subr.bf16.mxu0 %v6784_v42  ;;  %vm7859_vm9 = vcmp.le.s32.totalorder %v2540_v7, 8  ;;  %v7863_v6 = vpack.c.bf16 %v2805_v31, %v2806_v37  ;;  %v2804_v39 = vsel %vm552_vm0, %v2780_v63, %v2781_v46 }
 0x3c8   : > { %v7868_v60 = vpack.c.bf16 %v2866_v47, %v7712_v9  ;;  %v7872_v36 = vsel %vm7728_vm12, %v2424_v25, 0.0  ;;  %v7876_v20 = vsel %vm7732_vm13, %v2422_v28, 0.0  ;;  %v2423_v29 = vmax.f32 %v2387_v61, 0.0 }
 0x3c9   : > { %v7878_v7 = vpack.c.bf16 %v2803_v15, %v2804_v39  ;;  %v2785_v18 = vrot.slane %v7872_v36, 7  ;;  %v2845_v26 = vrot.slane %v7872_v36, 1  ;;  %v2783_v63 = vrot.slane %v7876_v20, 7 }
 0x3ca   : > { %v2843_v9 = vrot.slane %v7876_v20, 1  ;;  %v7886_v46 = vsel %vm7751_vm14, %v2425_v43, 0.0  ;;  %v7888_v21 = vpack.c.bf16 %v2425_v43, %v2424_v25  ;;  %v2726_v1 = vsel %vm7755_vm15, %v2423_v29, 0.0  ;;  %6111 = vmatpush3.bf16.msra.mxu0 %v6784_v42  ;;  %v6070_v45 = vpop.f32.mrb[28].mxu0  ;;  %vm7982_vm15 = vmpackc.low %vm7859_vm9, %vm7827_vm7 }
 0x3cb   : > { %v7892_v34 = vpack.c.bf16 %v2423_v29, %v2422_v28  ;;  %v2786_v15 = vrot.slane %v7886_v46, 7  ;;  %v2846_v47 = vrot.slane %v7886_v46, 1  ;;  %v2784_v25 = vrot.slane %v2726_v1, 7  ;;  %v2399_v31 = vpop.f32.mrb[29].mxu0  ;;  %6112 = vmatprep.subr.bf16.mxu0 %v6785_v32 }
 0x3cc   : > { %v2844_v61 = vrot.slane %v2726_v1, 1  ;;  %v2408_v38 = vadd.f32 %v6070_v45, %v2267_v58  ;;  %v2400_v28 = vadd.f32 %v2399_v31, %v2265_v14  ;;  %v6071_v43 = vpop.f32.mrb[30].mxu0  ;;  %v2802_v33 = vsel %vm552_vm0, %v2782_v56, %v2783_v63 }
 0x3cd   : > { %vm8437_vm12 = vcmp.lt.s32.totalorder %v6991_v30, 7  ;;  %v2411_v39 = vadd.f32 %v6071_v43, %v2268_v16  ;;  %6097 = vmatmul.mubr.msk.bf16.gmra.mrb[40].mxu0 %vm7898_vm10, %v7892_v34  ;;  %v2402_v58 = vpop.f32.mrb[31].mxu0  ;;  %v2801_v14 = vsel %vm552_vm0, %v2783_v63, %v2784_v25  ;;  %v2799_v56 = vsel %vm552_vm0, %v2785_v18, %v2786_v15  ;;  %v6787_v63 = vld [vmem:[%s8387_s4 + $0x30] sm:$0xff]   ;;  %v6837_v30 = vld [vmem:[%s8387_s4 + $0x200] sm:$0xff]  }
 0x3ce   : > { %v2864_v62 = vsel %vm8437_vm12, %v2840_v10, %v2841_v44  ;;  %v2800_v29 = vsel %vm552_vm0, %v2784_v25, %v2785_v18  ;;  %v2428_v1 = vmax.f32 %v2408_v38, 0.0  ;;  %v2426_v45 = vmax.f32 %v2400_v28, 0.0  ;;  %6113 = vmatpush3.bf16.msra.mxu0 %v6785_v32  ;;  %6100 = vmatprep.mubr.msk.bf16.mxu0 %vm7908_vm1, %v7888_v21  ;;  %vm8438_vm13 = vmmov %vm8437_vm12 }
 0x3cf   : > { %v2403_v24 = vadd.f32 %v2402_v58, %v2266_v2  ;;  %v7943_v16 = vpack.c.bf16 %v2801_v14, %v2802_v33  ;;  %v2429_v31 = vmax.f32 %v2411_v39, 0.0  ;;  %6114 = vmatprep.subr.bf16.mxu0 %v6786_v8  ;;  %v7948_v43 = vpack.c.bf16 %v2799_v56, %v2800_v29  ;;  %vm8439_vm14 = vmmov %vm8437_vm12 }
 0x3d0   : > { %v2865_v19 = vsel %vm8438_vm13, %v2839_v40, %v2840_v10  ;;  %v2862_v2 = vsel %vm8439_vm14, %v2842_v12, %v2843_v9  ;;  %v2731_v32 = vsel %vm7821_vm6, %v2428_v1, 0.0  ;;  %v2729_v18 = vsel %vm7827_vm7, %v2426_v45, 0.0  ;;  %vm8442_vm7 = vmmov %vm8437_vm12 }
 0x3d1   : > { %v2427_v25 = vmax.f32 %v2403_v24, 0.0  ;;  %v7966_v17 = vpack.c.bf16 %v2864_v62, %v2865_v19  ;;  %v2789_v48 = vrot.slane %v2731_v32, 7  ;;  %v2849_v38 = vrot.slane %v2731_v32, 1  ;;  %vm8444_vm12 = vmmov %vm8442_vm7 }
 0x3d2   : > { %v2787_v28 = vrot.slane %v2729_v18, 7  ;;  %v2847_v40 = vrot.slane %v2729_v18, 1  ;;  %v7970_v10 = vsel %vm7855_vm8, %v2429_v31, 0.0  ;;  %v7972_v33 = vpack.c.bf16 %v2429_v31, %v2428_v1  ;;  %6115 = vmatpush3.bf16.msra.mxu0 %v6786_v8  ;;  %vm8445_vm13 = vmmov %vm8442_vm7 }
 0x3d3   : > { %v2730_v39 = vsel %vm7859_vm9, %v2427_v25, 0.0  ;;  %v7976_v58 = vpack.c.bf16 %v2427_v25, %v2426_v45  ;;  %v2790_v14 = vrot.slane %v7970_v10, 7  ;;  %v2850_v56 = vrot.slane %v7970_v10, 1  ;;  %6116 = vmatprep.subr.bf16.mxu0 %v6787_v63  ;;  %v6788_v45 = vld [vmem:[%s8387_s4 + $0x38] sm:$0xff]   ;;  %vm8443_vm9 = vmmov %vm8442_vm7 }
 0x3d4   : > { %v2788_v29 = vrot.slane %v2730_v39, 7  ;;  %v2848_v1 = vrot.slane %v2730_v39, 1  ;;  %v2798_v52 = vsel %vm552_vm0, %v2786_v15, %v2787_v28  ;;  %v2863_v13 = vsel %vm8442_vm7, %v2841_v44, %v2842_v12  ;;  %vm8448_vm14 = vmmov %vm8442_vm7  ;;  %v6793_v39 = vld [vmem:[%s8387_s4 + $0xa0] sm:$0xff]  }
 0x3d5   : > { %v2860_v8 = vsel %vm8443_vm9, %v2844_v61, %v2845_v26  ;;  %v2861_v24 = vsel %vm8444_vm12, %v2843_v9, %v2844_v61  ;;  %6101 = vmatmul.mubr.msk.bf16.gmra.mrb[44].mxu0 %vm7982_vm15, %v7976_v58  ;;  %v8012_v35 = vpack.c.bf16 %v2862_v2, %v2863_v13  ;;  %v2858_v12 = vsel %vm8445_vm13, %v2846_v47, %v2847_v40  ;;  %vm8449_vm9 = vmmov %vm8442_vm7 }
 0x3d6   : > { %v2797_v23 = vsel %vm552_vm0, %v2787_v28, %v2788_v29  ;;  %v8014_v44 = vpack.c.bf16 %v2860_v8, %v2861_v24  ;;  %6117 = vmatpush3.bf16.msra.mxu0 %v6787_v63  ;;  %v8446_v20 = vpack.c.bf16 %v7572_v22, %v7572_v22  ;;  %v8447_v15 = vmov 0.0   ;;  %v6789_v63 = vld [vmem:[%s8387_s4 + $0x80] sm:$0xff]   ;;  %vm8450_vm12 = vmmov %vm8442_vm7  ;;  %v6798_v8 = vld [vmem:[%s8387_s4 + $0xc8] sm:$0xff]  }
 0x3d7   : > { %v8023_v9 = vpack.c.bf16 %v2797_v23, %v2798_v52  ;;  %v8026_v61 = vrot.slane %v8447_v15, 1  ;;  %v2859_v31 = vsel %vm8448_vm14, %v2845_v26, %v2846_v47  ;;  %v2856_v19 = vsel %vm8442_vm7, %v2848_v1, %v2849_v38  ;;  %6118 = vmatprep.subr.bf16.mxu0 %v6788_v45  ;;  %vm8451_vm13 = vmmov %vm8442_vm7  ;;  %v6796_v52 = vld [vmem:[%s8387_s4 + $0xb8] sm:$0xff]   ;;  %v6799_v24 = vld [vmem:[%s8387_s4 + $0xd0] sm:$0xff]  }
 0x3d8   : > { %6120 = vmatprep.mubr.bf16.mxu0 %v8446_v20  ;;  %v8039_v2 = vpack.c.bf16 %v2858_v12, %v2859_v31  ;;  %v2857_v32 = vsel %vm8449_vm9, %v2847_v40, %v2848_v1  ;;  %v2795_v36 = vsel %vm552_vm0, %v2789_v48, %v2790_v14  ;;  %v2796_v26 = vsel %vm552_vm0, %v2788_v29, %v2789_v48  ;;  %v6790_v40 = vld [vmem:[%s8387_s4 + $0x88] sm:$0xff]   ;;  %v6791_v48 = vld [vmem:[%s8387_s4 + $0x90] sm:$0xff]   ;;  %vm8453_vm14 = vmmov %vm8442_vm7 }
 0x3d9   : > { %v8049_v46 = vpack.c.bf16 %v2856_v19, %v2857_v32  ;;  %v8051_v47 = vpack.c.bf16 %v2795_v36, %v2796_v26  ;;  %v2854_v18 = vsel %vm8450_vm12, %v2850_v56, %v8026_v61  ;;  %v2855_v25 = vsel %vm8451_vm13, %v2849_v38, %v2850_v56  ;;  %v6792_v38 = vld [vmem:[%s8387_s4 + $0x98] sm:$0xff]   ;;  %v6794_v56 = vld [vmem:[%s8387_s4 + $0xa8] sm:$0xff]   ;;  %v6795_v29 = vld [vmem:[%s8387_s4 + $0xb0] sm:$0xff]  }
 0x3da   : > { %v8058_v28 = vpack.c.bf16 %v2854_v18, %v2855_v25  ;;  %6119 = vmatpush3.bf16.msra.mxu0 %v6788_v45  ;;  %v8452_v1 = vrot.slane %v7657_v54, 1  ;;  %v6797_v54 = vld [vmem:[%s8387_s4 + $0xc0] sm:$0xff]   ;;  %v6800_v23 = vld [vmem:[%s8387_s4 + $0xd8] sm:$0xff]   ;;  %v6802_v20 = vld [vmem:[%s8387_s4 + $0xe8] sm:$0xff]   ;;  %v2882_v5 = vpack.c.bf16 %v8026_v61, %v8026_v61 }
 0x3db   : > { %6136 = vmatprep.subr.bf16.mxu0 %v6789_v63  ;;  %v6801_v12 = vld [vmem:[%s8387_s4 + $0xe0] sm:$0xff]   ;;  %v6803_v15 = vld [vmem:[%s8387_s4 + $0xf0] sm:$0xff]   ;;  %v6804_v31 = vld [vmem:[%s8387_s4 + $0xf8] sm:$0xff]  }
 0x3dc   : > { %v2870_v45 = vsel %vm8453_vm14, %v8026_v61, %v8452_v1  ;;  %v6805_v19 = vld [vmem:[%s8387_s4 + $0x100] sm:$0xff]   ;;  %v6808_v32 = vld [vmem:[%s8387_s4 + $0x118] sm:$0xff]   ;;  %v6810_v26 = vld [vmem:[%s8387_s4 + $0x128] sm:$0xff]  }
 0x3dd   : > { %6121 = vmatmul.mubr.bf16.vlgmr.msra.gmra.mrb[32].mxu0 %v7736_v55  ;;  %v2873_v13 = vpack.c.bf16 %v2870_v45, %v8026_v61  ;;  %v6809_v36 = vld [vmem:[%s8387_s4 + $0x120] sm:$0xff]   ;;  %v6811_v18 = vld [vmem:[%s8387_s4 + $0x130] sm:$0xff]   ;;  %v6812_v25 = vld [vmem:[%s8387_s4 + $0x138] sm:$0xff]  }
 0x3de   : > { %6137 = vmatpush3.bf16.msra.mxu0 %v6789_v63  ;;  %6124 = vmatprep.mubr.bf16.mxu0 %v7771_v57  ;;  %v6806_v63 = vld [vmem:[%s8387_s4 + $0x108] sm:$0xff]   ;;  %vm8454_vm7 = vmpackc.low %vm7584_vm5, %vm7567_vm3  ;;  %v6821_v45 = vld [vmem:[%s8387_s4 + $0x180] sm:$0xff]  }
 0x3df   : > { %6138 = vmatprep.subr.bf16.mxu0 %v6790_v40  ;;  %vm5354_vm3 = vmpackc.low %vm7855_vm8, %vm7821_vm6  ;;  %v6846_v1 = vld [vmem:[%s8388_s5 + $0x8] sm:$0xff]  }
 0x3e2   : > { %6139 = vmatpush3.bf16.msra.mxu0 %v6790_v40  ;;  %v6813_v40 = vld [vmem:[%s8387_s4 + $0x140] sm:$0xff]  }
 0x3e3   : > { %6140 = vmatprep.subr.bf16.mxu0 %v6791_v48 }
 0x3e5   : > { %6125 = vmatmul.mubr.bf16.gmra.mrb[36].mxu0 %v7863_v6 }
 0x3e6   : > { %6141 = vmatpush3.bf16.msra.mxu0 %v6791_v48  ;;  %6128 = vmatprep.mubr.bf16.mxu0 %v7878_v7  ;;  %v6814_v48 = vld [vmem:[%s8387_s4 + $0x148] sm:$0xff]  }
 0x3e7   : > { %6142 = vmatprep.subr.bf16.mxu0 %v6792_v38 }
 0x3ea   : > { %6143 = vmatpush3.bf16.msra.mxu0 %v6792_v38  ;;  %v6818_v38 = vld [vmem:[%s8387_s4 + $0x168] sm:$0xff]  }
 0x3eb   : > { %6144 = vmatprep.subr.bf16.mxu0 %v6793_v39 }
 0x3ed   : > { %6129 = vmatmul.mubr.bf16.gmra.mrb[40].mxu0 %v7943_v16 }
 0x3ee   : > { %6145 = vmatpush3.bf16.msra.mxu0 %v6793_v39  ;;  %6132 = vmatprep.mubr.bf16.mxu0 %v7948_v43  ;;  %v6819_v39 = vld [vmem:[%s8387_s4 + $0x170] sm:$0xff]  }
 0x3ef   : > { %6146 = vmatprep.subr.bf16.mxu0 %v6794_v56 }
 0x3f2   : > { %6147 = vmatpush3.bf16.msra.mxu0 %v6794_v56  ;;  %v6820_v56 = vld [vmem:[%s8387_s4 + $0x178] sm:$0xff]  }
 0x3f3   : > { %6148 = vmatprep.subr.bf16.mxu0 %v6795_v29 }
 0x3f5   : > { %6133 = vmatmul.mubr.bf16.gmra.mrb[44].mxu0 %v8023_v9 }
 0x3f6   : > { %6149 = vmatpush3.bf16.msra.mxu0 %v6795_v29  ;;  %6152 = vmatprep.mubr.bf16.mxu0 %v2873_v13  ;;  %v6845_v29 = vld [vmem:[%s8388_s5] sm:$0xff]   ;;  %v6822_v13 = vld [vmem:[%s8387_s4 + $0x188] sm:$0xff]  }
 0x3f7   : > { %6150 = vmatprep.subr.bf16.mxu0 %v6796_v52  ;;  %6360 = vmatprep.subr.bf16.mxu1 %v6845_v29 }
 0x3f8   : > { %6361 = vmatpush3.bf16.msra.mxu1 %v6845_v29 }
 0x3f9   : > { %6362 = vmatprep.subr.bf16.mxu1 %v6846_v1 }
 0x3fa   : > { %6151 = vmatpush3.bf16.msra.mxu0 %v6796_v52  ;;  %v6847_v52 = vld [vmem:[%s8388_s5 + $0x10] sm:$0xff]  }
 0x3fb   : > { %6168 = vmatprep.subr.bf16.mxu0 %v6797_v54 }
 0x3fc   : > { %6363 = vmatpush3.bf16.msra.mxu1 %v6846_v1 }
 0x3fd   : > { %6153 = vmatmul.mubr.bf16.vlgmr.msra.gmra.mrb[32].mxu0 %v7738_v11  ;;  %6364 = vmatprep.subr.bf16.mxu1 %v6847_v52 }
 0x3fe   : > { %6169 = vmatpush3.bf16.msra.mxu0 %v6797_v54  ;;  %6156 = vmatprep.mubr.bf16.mxu0 %v7868_v60  ;;  %v6823_v54 = vld [vmem:[%s8387_s4 + $0x190] sm:$0xff]  }
 0x3ff   : > { %6170 = vmatprep.subr.bf16.mxu0 %v6798_v8 }
 0x400   : > { %6365 = vmatpush3.bf16.msra.mxu1 %v6847_v52 }
 0x402   : > { %6171 = vmatpush3.bf16.msra.mxu0 %v6798_v8  ;;  %v6849_v8 = vld [vmem:[%s8388_s5 + $0x20] sm:$0xff]  }
 0x403   : > { %6172 = vmatprep.subr.bf16.mxu0 %v6799_v24 }
 0x405   : > { %6157 = vmatmul.mubr.bf16.gmra.mrb[36].mxu0 %v7966_v17 }
 0x406   : > { %6173 = vmatpush3.bf16.msra.mxu0 %v6799_v24  ;;  %6160 = vmatprep.mubr.bf16.mxu0 %v8012_v35  ;;  %v6824_v24 = vld [vmem:[%s8387_s4 + $0x198] sm:$0xff]  }
 0x407   : > { %6174 = vmatprep.subr.bf16.mxu0 %v6800_v23 }
 0x40a   : > { %6175 = vmatpush3.bf16.msra.mxu0 %v6800_v23  ;;  %v6850_v23 = vld [vmem:[%s8388_s5 + $0x28] sm:$0xff]  }
 0x40b   : > { %6176 = vmatprep.subr.bf16.mxu0 %v6801_v12 }
 0x40d   : > { %6161 = vmatmul.mubr.bf16.gmra.mrb[40].mxu0 %v8014_v44 }
 0x40e   : > { %6177 = vmatpush3.bf16.msra.mxu0 %v6801_v12  ;;  %6164 = vmatprep.mubr.bf16.mxu0 %v8039_v2  ;;  %v6825_v12 = vld [vmem:[%s8387_s4 + $0x1a0] sm:$0xff]  }
 0x40f   : > { %6178 = vmatprep.subr.bf16.mxu0 %v6802_v20 }
 0x412   : > { %6179 = vmatpush3.bf16.msra.mxu0 %v6802_v20  ;;  %v6826_v20 = vld [vmem:[%s8387_s4 + $0x1a8] sm:$0xff]  }
 0x413   : > { %6180 = vmatprep.subr.bf16.mxu0 %v6803_v15 }
 0x415   : > { %6165 = vmatmul.mubr.bf16.gmra.mrb[44].mxu0 %v8049_v46 }
 0x416   : > { %6181 = vmatpush3.bf16.msra.mxu0 %v6803_v15  ;;  %6184 = vmatprep.mubr.bf16.mxu0 %v7736_v55  ;;  %v6807_v55 = vld [vmem:[%s8387_s4 + $0x110] sm:$0xff]  }
 0x417   : > { %6182 = vmatprep.subr.bf16.mxu0 %v6804_v31  ;;  %v6827_v15 = vld [vmem:[%s8387_s4 + $0x1b0] sm:$0xff]  }
 0x41a   : > { %6183 = vmatpush3.bf16.msra.mxu0 %v6804_v31  ;;  %v6828_v31 = vld [vmem:[%s8387_s4 + $0x1b8] sm:$0xff]  }
 0x41b   : > { %6200 = vmatprep.subr.bf16.mxu0 %v6805_v19 }
 0x41d   : > { %6185 = vmatmul.mubr.bf16.vlgmr.msra.gmra.mrb[32].mxu0 %v7771_v57 }
 0x41e   : > { %6201 = vmatpush3.bf16.msra.mxu0 %v6805_v19  ;;  %6188 = vmatprep.mubr.bf16.mxu0 %v7863_v6  ;;  %v6829_v19 = vld [vmem:[%s8387_s4 + $0x1c0] sm:$0xff]  }
 0x41f   : > { %6202 = vmatprep.subr.bf16.mxu0 %v6806_v63 }
 0x422   : > { %6203 = vmatpush3.bf16.msra.mxu0 %v6806_v63  ;;  %v6830_v63 = vld [vmem:[%s8387_s4 + $0x1c8] sm:$0xff]  }
 0x423   : > { %6204 = vmatprep.subr.bf16.mxu0 %v6807_v55 }
 0x425   : > { %6189 = vmatmul.mubr.bf16.gmra.mrb[36].mxu0 %v7878_v7 }
 0x426   : > { %6205 = vmatpush3.bf16.msra.mxu0 %v6807_v55  ;;  %6192 = vmatprep.mubr.bf16.mxu0 %v7943_v16  ;;  %v6832_v55 = vld [vmem:[%s8387_s4 + $0x1d8] sm:$0xff]  }
 0x427   : > { %6206 = vmatprep.subr.bf16.mxu0 %v6808_v32 }
 0x42a   : > { %6207 = vmatpush3.bf16.msra.mxu0 %v6808_v32 }
 0x42b   : > { %6208 = vmatprep.subr.bf16.mxu0 %v6809_v36 }
 0x42d   : > { %6193 = vmatmul.mubr.bf16.gmra.mrb[40].mxu0 %v7948_v43 }
 0x42e   : > { %6209 = vmatpush3.bf16.msra.mxu0 %v6809_v36  ;;  %6196 = vmatprep.mubr.bf16.mxu0 %v8023_v9 }
 0x42f   : > { %6210 = vmatprep.subr.bf16.mxu0 %v6810_v26 }
 0x432   : > { %6211 = vmatpush3.bf16.msra.mxu0 %v6810_v26 }
 0x433   : > { %6212 = vmatprep.subr.bf16.mxu0 %v6811_v18 }
 0x435   : > { %6197 = vmatmul.mubr.bf16.gmra.mrb[44].mxu0 %v8051_v47 }
 0x436   : > { %6213 = vmatpush3.bf16.msra.mxu0 %v6811_v18  ;;  %6216 = vmatprep.mubr.msk.bf16.mxu0 %vm8454_vm7, %v7677_v4  ;;  %v6817_v4 = vld [vmem:[%s8387_s4 + $0x160] sm:$0xff]  }
 0x437   : > { %6214 = vmatprep.subr.bf16.mxu0 %v6812_v25 }
 0x43a   : > { %6215 = vmatpush3.bf16.msra.mxu0 %v6812_v25 }
 0x43b   : > { %6232 = vmatprep.subr.bf16.mxu0 %v6813_v40 }
 0x43d   : > { %6217 = vmatmul.mubr.msk.bf16.vlgmr.msra.gmra.mrb[32].mxu0 %vm7683_vm11, %v7667_v50 }
 0x43e   : > { %6233 = vmatpush3.bf16.msra.mxu0 %v6813_v40  ;;  %6220 = vmatprep.mubr.msk.bf16.mxu0 %vm7785_vm2, %v7795_v3 }
 0x43f   : > { %6234 = vmatprep.subr.bf16.mxu0 %v6814_v48 }
 0x442   : > { %6235 = vmatpush3.bf16.msra.mxu0 %v6814_v48 }
 0x443   : > { %6236 = vmatprep.subr.bf16.mxu0 %v6815_v0 }
 0x445   : > { %6221 = vmatmul.mubr.msk.bf16.gmra.mrb[36].mxu0 %vm7801_vm4, %v7779_v59 }
 0x446   : > { %6237 = vmatpush3.bf16.msra.mxu0 %v6815_v0  ;;  %6224 = vmatprep.mubr.msk.bf16.mxu0 %vm7898_vm10, %v7892_v34 }
 0x447   : > { %6238 = vmatprep.subr.bf16.mxu0 %v6816_v51 }
 0x44a   : > { %6239 = vmatpush3.bf16.msra.mxu0 %v6816_v51 }
 0x44b   : > { %6240 = vmatprep.subr.bf16.mxu0 %v6817_v4 }
 0x44d   : > { %6225 = vmatmul.mubr.msk.bf16.gmra.mrb[40].mxu0 %vm7908_vm1, %v7888_v21 }
 0x44e   : > { %6241 = vmatpush3.bf16.msra.mxu0 %v6817_v4  ;;  %6228 = vmatprep.mubr.msk.bf16.mxu0 %vm7982_vm15, %v7976_v58 }
 0x44f   : > { %6242 = vmatprep.subr.bf16.mxu0 %v6818_v38 }
 0x452   : > { %6243 = vmatpush3.bf16.msra.mxu0 %v6818_v38 }
 0x453   : > { %6244 = vmatprep.subr.bf16.mxu0 %v6819_v39 }
 0x455   : > { %6229 = vmatmul.mubr.msk.bf16.gmra.mrb[44].mxu0 %vm5354_vm3, %v7972_v33 }
 0x456   : > { %6245 = vmatpush3.bf16.msra.mxu0 %v6819_v39  ;;  %6248 = vmatprep.mubr.bf16.mxu0 %v7738_v11  ;;  %v6848_v11 = vld [vmem:[%s8388_s5 + $0x18] sm:$0xff]  }
 0x457   : > { %6246 = vmatprep.subr.bf16.mxu0 %v6820_v56  ;;  %6366 = vmatprep.subr.bf16.mxu1 %v6848_v11 }
 0x458   : > { %6367 = vmatpush3.bf16.msra.mxu1 %v6848_v11 }
 0x459   : > { %6368 = vmatprep.subr.bf16.mxu1 %v6849_v8 }
 0x45a   : > { %6247 = vmatpush3.bf16.msra.mxu0 %v6820_v56 }
 0x45b   : > { %6264 = vmatprep.subr.bf16.mxu0 %v6821_v45 }
 0x45c   : > { %6369 = vmatpush3.bf16.msra.mxu1 %v6849_v8 }
 0x45d   : > { %6249 = vmatmul.mubr.bf16.vlgmr.msra.gmra.mrb[32].mxu0 %v7868_v60  ;;  %6370 = vmatprep.subr.bf16.mxu1 %v6850_v23 }
 0x45e   : > { %6265 = vmatpush3.bf16.msra.mxu0 %v6821_v45  ;;  %6252 = vmatprep.mubr.bf16.mxu0 %v7966_v17 }
 0x45f   : > { %6266 = vmatprep.subr.bf16.mxu0 %v6822_v13 }
 0x460   : > { %6371 = vmatpush3.bf16.msra.mxu1 %v6850_v23 }
 0x461   : > { %6372 = vmatprep.subr.bf16.mxu1 %v6851_v53 }
 0x462   : > { %6267 = vmatpush3.bf16.msra.mxu0 %v6822_v13 }
 0x463   : > { %6268 = vmatprep.subr.bf16.mxu0 %v6823_v54 }
 0x464   : > { %6373 = vmatpush3.bf16.msra.mxu1 %v6851_v53 }
 0x465   : > { %6253 = vmatmul.mubr.bf16.gmra.mrb[36].mxu0 %v8012_v35 }
 0x466   : > { %6269 = vmatpush3.bf16.msra.mxu0 %v6823_v54  ;;  %6256 = vmatprep.mubr.bf16.mxu0 %v8014_v44 }
 0x467   : > { %6270 = vmatprep.subr.bf16.mxu0 %v6824_v24 }
 0x46a   : > { %6271 = vmatpush3.bf16.msra.mxu0 %v6824_v24 }
 0x46b   : > { %6272 = vmatprep.subr.bf16.mxu0 %v6825_v12 }
 0x46d   : > { %6257 = vmatmul.mubr.bf16.gmra.mrb[40].mxu0 %v8039_v2 }
 0x46e   : > { %6273 = vmatpush3.bf16.msra.mxu0 %v6825_v12  ;;  %6260 = vmatprep.mubr.bf16.mxu0 %v8049_v46 }
 0x46f   : > { %6274 = vmatprep.subr.bf16.mxu0 %v6826_v20 }
 0x472   : > { %6275 = vmatpush3.bf16.msra.mxu0 %v6826_v20 }
 0x473   : > { %6276 = vmatprep.subr.bf16.mxu0 %v6827_v15 }
 0x475   : > { %6261 = vmatmul.mubr.bf16.gmra.mrb[44].mxu0 %v8058_v28 }
 0x476   : > { %6277 = vmatpush3.bf16.msra.mxu0 %v6827_v15  ;;  %6280 = vmatprep.mubr.bf16.mxu0 %v7771_v57  ;;  %v6831_v57 = vld [vmem:[%s8387_s4 + $0x1d0] sm:$0xff]  }
 0x477   : > { %6278 = vmatprep.subr.bf16.mxu0 %v6828_v31 }
 0x47a   : > { %6279 = vmatpush3.bf16.msra.mxu0 %v6828_v31 }
 0x47b   : > { %6296 = vmatprep.subr.bf16.mxu0 %v6829_v19 }
 0x47d   : > { %6281 = vmatmul.mubr.bf16.vlgmr.msra.gmra.mrb[32].mxu0 %v7863_v6  ;;  %v6833_v6 = vld [vmem:[%s8387_s4 + $0x1e0] sm:$0xff]  }
 0x47e   : > { %6297 = vmatpush3.bf16.msra.mxu0 %v6829_v19  ;;  %6284 = vmatprep.mubr.bf16.mxu0 %v7878_v7  ;;  %v6834_v7 = vld [vmem:[%s8387_s4 + $0x1e8] sm:$0xff]  }
 0x47f   : > { %6298 = vmatprep.subr.bf16.mxu0 %v6830_v63 }
 0x482   : > { %6299 = vmatpush3.bf16.msra.mxu0 %v6830_v63 }
 0x483   : > { %6300 = vmatprep.subr.bf16.mxu0 %v6831_v57 }
 0x485   : > { %6285 = vmatmul.mubr.bf16.gmra.mrb[36].mxu0 %v7943_v16  ;;  %v6835_v16 = vld [vmem:[%s8387_s4 + $0x1f0] sm:$0xff]  }
 0x486   : > { %6301 = vmatpush3.bf16.msra.mxu0 %v6831_v57  ;;  %6288 = vmatprep.mubr.bf16.mxu0 %v7948_v43  ;;  %v2794_v43 = vsel %vm552_vm0, %v2790_v14, %v7572_v22 }
 0x487   : > { %6302 = vmatprep.subr.bf16.mxu0 %v6832_v55  ;;  %v2822_v32 = vpack.c.bf16 %v7572_v22, %v2794_v43  ;;  %v6838_v22 = vld [vmem:[%s8387_s4 + $0x208] sm:$0xff]  }
 0x48a   : > { %6303 = vmatpush3.bf16.msra.mxu0 %v6832_v55 }
 0x48b   : > { %6304 = vmatprep.subr.bf16.mxu0 %v6833_v6 }
 0x48d   : > { %6289 = vmatmul.mubr.bf16.gmra.mrb[40].mxu0 %v8023_v9  ;;  %v6836_v9 = vld [vmem:[%s8387_s4 + $0x1f8] sm:$0xff]  }
 0x48e   : > { %6305 = vmatpush3.bf16.msra.mxu0 %v6833_v6  ;;  %6292 = vmatprep.mubr.bf16.mxu0 %v8051_v47 }
 0x48f   : > { %6306 = vmatprep.subr.bf16.mxu0 %v6834_v7 }
 0x492   : > { %6307 = vmatpush3.bf16.msra.mxu0 %v6834_v7 }
 0x493   : > { %6308 = vmatprep.subr.bf16.mxu0 %v6835_v16 }
 0x495   : > { %6293 = vmatmul.mubr.bf16.gmra.mrb[44].mxu0 %v2822_v32 }
 0x496   : > { %6309 = vmatpush3.bf16.msra.mxu0 %v6835_v16  ;;  %6312 = vmatprep.mubr.msk.bf16.mxu0 %vm7683_vm11, %v7667_v50  ;;  %v6839_v50 = vld [vmem:[%s8387_s4 + $0x210] sm:$0xff]  }
 0x497   : > { %6310 = vmatprep.subr.bf16.mxu0 %v6836_v9 }
 0x49a   : > { %6311 = vmatpush3.bf16.msra.mxu0 %v6836_v9 }
 0x49b   : > { %6328 = vmatprep.subr.bf16.mxu0 %v6837_v30 }
 0x49d   : > { %6313 = vmatmul.mubr.msk.bf16.vlgmr.msra.gmra.mrb[32].mxu0 %vm7785_vm2, %v7795_v3  ;;  %v6843_v3 = vld [vmem:[%s8387_s4 + $0x230] sm:$0xff]  }
 0x49e   : > { %6329 = vmatpush3.bf16.msra.mxu0 %v6837_v30  ;;  %6316 = vmatprep.mubr.msk.bf16.mxu0 %vm7801_vm4, %v7779_v59  ;;  %v6841_v59 = vld [vmem:[%s8387_s4 + $0x220] sm:$0xff]  }
 0x49f   : > { %6330 = vmatprep.subr.bf16.mxu0 %v6838_v22 }
 0x4a2   : > { %6331 = vmatpush3.bf16.msra.mxu0 %v6838_v22 }
 0x4a3   : > { %6332 = vmatprep.subr.bf16.mxu0 %v6839_v50 }
 0x4a5   : > { %6317 = vmatmul.mubr.msk.bf16.gmra.mrb[36].mxu0 %vm7898_vm10, %v7892_v34 }
 0x4a6   : > { %6333 = vmatpush3.bf16.msra.mxu0 %v6839_v50  ;;  %6320 = vmatprep.mubr.msk.bf16.mxu0 %vm7908_vm1, %v7888_v21  ;;  %v8455_v21 = vmov 0.0|0.0  }
 0x4a7   : > { %6334 = vmatprep.subr.bf16.mxu0 %v6840_v49 }
 0x4aa   : > { %6335 = vmatpush3.bf16.msra.mxu0 %v6840_v49 }
 0x4ab   : > { %6336 = vmatprep.subr.bf16.mxu0 %v6841_v59 }
 0x4ad   : > { %6321 = vmatmul.mubr.msk.bf16.gmra.mrb[40].mxu0 %vm7982_vm15, %v7976_v58 }
 0x4ae   : > { %6337 = vmatpush3.bf16.msra.mxu0 %v6841_v59  ;;  %6324 = vmatprep.mubr.msk.bf16.mxu0 %vm5354_vm3, %v7972_v33 }
 0x4af   : > { %6338 = vmatprep.subr.bf16.mxu0 %v6842_v27 }
 0x4b2   : > { %6339 = vmatpush3.bf16.msra.mxu0 %v6842_v27 }
 0x4b3   : > { %6340 = vmatprep.subr.bf16.mxu0 %v6843_v3 }
 0x4b5   : > { %6325 = vmatmul.mubr.bf16.gmra.mrb[44].mxu0 %v8455_v21 }
 0x4b6   : > { %6341 = vmatpush3.bf16.msra.mxu0 %v6843_v3  ;;  %6344 = vmatprep.mubr.bf16.mxu0 %v7868_v60  ;;  %v6852_v60 = vld [vmem:[%s8388_s5 + $0x38] sm:$0xff]  }
 0x4b7   : > { %6342 = vmatprep.subr.bf16.mxu0 %v6844_v41  ;;  %6374 = vmatprep.subr.bf16.mxu1 %v6852_v60 }
 0x4b8   : > { %6375 = vmatpush3.bf16.msra.mxu1 %v6852_v60 }
 0x4ba   : > { %6343 = vmatpush3.bf16.msra.mxu0 %v6844_v41 }
 0x4bd   : > { %6345 = vmatmul.mubr.bf16.vlgmr.msra.gmra.mrb[32].mxu0 %v7966_v17 }
 0x4be   : > { %6348 = vmatprep.mubr.bf16.mxu0 %v8012_v35 }
 0x4c5   : > { %6349 = vmatmul.mubr.bf16.gmra.mrb[36].mxu0 %v8014_v44 }
 0x4c6   : > { %6352 = vmatprep.mubr.bf16.mxu0 %v8039_v2 }
 0x4cd   : > { %6353 = vmatmul.mubr.bf16.gmra.mrb[40].mxu0 %v8049_v46 }
 0x4ce   : > { %6356 = vmatprep.mubr.bf16.mxu0 %v8058_v28 }
 0x4d5   : > { %6357 = vmatmul.mubr.bf16.gmra.mrb[44].mxu0 %v2882_v5 }
 0x590   : > { %v6346_v34 = vpop.f32.mrb[32].mxu0 }
 0x591   : > { %v4373_v37 = vpop.f32.mrb[33].mxu0  ;;  %v4454_v17 = vmax.f32 %v6346_v34, 0.0 }
 0x592   : > { %v6347_v42 = vpop.f32.mrb[34].mxu0  ;;  %v4452_v58 = vmax.f32 %v4373_v37, 0.0 }
 0x593   : > { %v4455_v10 = vmax.f32 %v6347_v42, 0.0  ;;  %v4376_v33 = vpop.f32.mrb[35].mxu0 }
 0x594   : > { %v4453_v62 = vmax.f32 %v4376_v33, 0.0 }
 0x595   : > { %v4469_v14 = vpack.c.bf16 %v4455_v10, %v4454_v17 }
 0x596   : > { %v4468_v35 = vpack.c.bf16 %v4453_v62, %v4452_v58 }
 0x598   : > { %v6350_v44 = vpop.f32.mrb[36].mxu0  ;;  %6376 = vmatprep.mubr.bf16.mxu1 %v4468_v35 }
 0x599   : > { %v4389_v61 = vpop.f32.mrb[37].mxu0  ;;  %6377 = vmatmul.mubr.bf16.vlgmr.msra.gmra.mrb[20].mxu1 %v4469_v14  ;;  %v4458_v46 = vmax.f32 %v6350_v44, 0.0 }
 0x59a   : > { %v6351_v2 = vpop.f32.mrb[38].mxu0  ;;  %v4456_v36 = vmax.f32 %v4389_v61, 0.0 }
 0x59b   : > { %v4459_v47 = vmax.f32 %v6351_v2, 0.0  ;;  %v4392_v28 = vpop.f32.mrb[39].mxu0 }
 0x59c   : > { %v4457_v26 = vmax.f32 %v4392_v28, 0.0 }
 0x59d   : > { %v4471_v18 = vpack.c.bf16 %v4459_v47, %v4458_v46 }
 0x59e   : > { %v4470_v25 = vpack.c.bf16 %v4457_v26, %v4456_v36 }
 0x5a0   : > { %v6354_v40 = vpop.f32.mrb[40].mxu0  ;;  %6380 = vmatprep.mubr.bf16.mxu1 %v4470_v25 }
 0x5a1   : > { %v4405_v48 = vpop.f32.mrb[41].mxu0  ;;  %6381 = vmatmul.mubr.bf16.gmra.mrb[24].mxu1 %v4471_v18  ;;  %v4462_v51 = vmax.f32 %v6354_v40, 0.0 }
 0x5a2   : > { %v6355_v0 = vpop.f32.mrb[42].mxu0  ;;  %v4460_v39 = vmax.f32 %v4405_v48, 0.0 }
 0x5a3   : > { %v4463_v4 = vmax.f32 %v6355_v0, 0.0  ;;  %v4408_v38 = vpop.f32.mrb[43].mxu0 }
 0x5a4   : > { %v4461_v56 = vmax.f32 %v4408_v38, 0.0 }
 0x5a5   : > { %v4473_v29 = vpack.c.bf16 %v4463_v4, %v4462_v51 }
 0x5a6   : > { %v4472_v1 = vpack.c.bf16 %v4461_v56, %v4460_v39 }
 0x5a8   : > { %v6358_v45 = vpop.f32.mrb[44].mxu0  ;;  %6384 = vmatprep.mubr.bf16.mxu1 %v4472_v1 }
 0x5a9   : > { %v4421_v52 = vpop.f32.mrb[45].mxu0  ;;  %6385 = vmatmul.mubr.bf16.gmra.mrb[28].mxu1 %v4473_v29  ;;  %v4466_v11 = vmax.f32 %v6358_v45, 0.0 }
 0x5aa   : > { %v6359_v13 = vpop.f32.mrb[46].mxu0  ;;  %v4464_v24 = vmax.f32 %v4421_v52, 0.0 }
 0x5ab   : > { %v4467_v54 = vmax.f32 %v6359_v13, 0.0  ;;  %v4424_v8 = vpop.f32.mrb[47].mxu0 }
 0x5ac   : > { %v4465_v23 = vmax.f32 %v4424_v8, 0.0 }
 0x5ad   : > { %v4475_v12 = vpack.c.bf16 %v4467_v54, %v4466_v11 }
 0x5ae   : > { %v4474_v20 = vpack.c.bf16 %v4465_v23, %v4464_v24 }
 0x5b0   : > { %6388 = vmatprep.mubr.bf16.mxu1 %v4474_v20 }
 0x5b1   : > { %6389 = vmatmul.mubr.bf16.gmra.mrb[32].mxu1 %v4475_v12 }
 0x66c   : > { %v6378_v15 = vpop.f32.mrb[20].mxu1 }
 0x66d   : > { %v4574_v31 = vpop.f32.mrb[21].mxu1  ;;  %v4639_v63 = vmax.f32 %v6378_v15, 0.0 }
 0x66e   : > { %v6379_v19 = vpop.f32.mrb[22].mxu1  ;;  %v4637_v6 = vmax.f32 %v4574_v31, 0.0 }
 0x66f   : > { %v4640_v57 = vmax.f32 %v6379_v19, 0.0  ;;  %v4577_v55 = vpop.f32.mrb[23].mxu1 }
 0x670   : > { %v4638_v7 = vmax.f32 %v4577_v55, 0.0 }
 0x671   : > { %v5273_v16 = vpack.c.bf16 %v4640_v57, %v4639_v63 }
 0x672   : > { %v5268_v43 = vpack.c.bf16 %v4638_v7, %v4637_v6 }
 0x673   : > { %5305 = vst [vmem:[%s8370_s20 + $0x8] sm:$0xff] %v5273_v16  }
 0x674   : > { %5269 = vst [vmem:[%s8370_s20] sm:$0xff] %v5268_v43   ;;  %v6382_v32 = vpop.f32.mrb[24].mxu1 }
 0x675   : > { %v4590_v9 = vpop.f32.mrb[25].mxu1  ;;  %v4643_v22 = vmax.f32 %v6382_v32, 0.0 }
 0x676   : > { %v6383_v30 = vpop.f32.mrb[26].mxu1  ;;  %v4641_v59 = vmax.f32 %v4590_v9, 0.0 }
 0x677   : > { %v4644_v50 = vmax.f32 %v6383_v30, 0.0  ;;  %v4593_v49 = vpop.f32.mrb[27].mxu1 }
 0x678   : > { %v4642_v27 = vmax.f32 %v4593_v49, 0.0 }
 0x679   : > { %v5283_v3 = vpack.c.bf16 %v4644_v50, %v4643_v22 }
 0x67a   : > { %v5278_v41 = vpack.c.bf16 %v4642_v27, %v4641_v59 }
 0x67b   : > { %5307 = vst [vmem:[%s8370_s20 + $0x18] sm:$0xff] %v5283_v3  }
 0x67c   : > { %5306 = vst [vmem:[%s8370_s20 + $0x10] sm:$0xff] %v5278_v41   ;;  %v6386_v21 = vpop.f32.mrb[28].mxu1 }
 0x67d   : > { %v4606_v5 = vpop.f32.mrb[29].mxu1  ;;  %v4647_v60 = vmax.f32 %v6386_v21, 0.0 }
 0x67e   : > { %v6387_v53 = vpop.f32.mrb[30].mxu1  ;;  %v4645_v42 = vmax.f32 %v4606_v5, 0.0 }
 0x67f   : > { %v4648_v34 = vmax.f32 %v6387_v53, 0.0  ;;  %v4609_v37 = vpop.f32.mrb[31].mxu1 }
 0x680   : > { %v4646_v17 = vmax.f32 %v4609_v37, 0.0 }
 0x681   : > { %v5293_v10 = vpack.c.bf16 %v4648_v34, %v4647_v60 }
 0x682   : > { %v5288_v33 = vpack.c.bf16 %v4646_v17, %v4645_v42 }
 0x683   : > { %5309 = vst [vmem:[%s8370_s20 + $0x28] sm:$0xff] %v5293_v10  }
 0x684   : > { %5308 = vst [vmem:[%s8370_s20 + $0x20] sm:$0xff] %v5288_v33   ;;  %v6390_v58 = vpop.f32.mrb[32].mxu1 }
 0x685   : > { %v4622_v62 = vpop.f32.mrb[33].mxu1  ;;  %v4651_v35 = vmax.f32 %v6390_v58, 0.0 }
 0x686   : > { %v6391_v14 = vpop.f32.mrb[34].mxu1  ;;  %v4649_v2 = vmax.f32 %v4622_v62, 0.0 }
 0x687   : > { %v4652_v44 = vmax.f32 %v6391_v14, 0.0  ;;  %v4625_v61 = vpop.f32.mrb[35].mxu1 }
 0x688   : > { %v4650_v46 = vmax.f32 %v4625_v61, 0.0 }
 0x689   : > { %v5303_v47 = vpack.c.bf16 %v4652_v44, %v4651_v35 }
 0x68a   : > { %v5298_v28 = vpack.c.bf16 %v4650_v46, %v4649_v2 }
 0x68b   : > { %5311 = vst [vmem:[%s8370_s20 + $0x38] sm:$0xff] %v5303_v47  }
 0x68c   : > { %5310 = vst [vmem:[%s8370_s20 + $0x30] sm:$0xff] %v5298_v28  }
 0x68d PF: > { %s16_s21 = sadd.s32 1, %s6875_s21  }
 0x68e   : > { %p13_p4 = scmp.ge.s32.totalorder %s16_s21, 4  }
 0x690   :  { %15 = sbr.rel (!%p13_p4) target bundleno = 1 (0x1), region = 90 }

</bundles_post_ra>
